<compile_context>
chip_gen: v5e
topology: v5e:2x2
jax: 0.10.0
libtpu: 0.0.40
codegen_flags: <defaults>
</compile_context>

<pallas_src>
import functools

import jax
import jax.numpy as jnp
from jax import lax
from jax.experimental import pallas as pl
from jax.experimental.pallas import tpu as pltpu


def _round_up(n, m):
    return (n + m - 1) // m * m


def net_kernel(seed_ref, x_ref, w1_ref, b1_ref, w2_ref, b2_ref, out_ref,
               *, p_drop: float, training: bool):
    # ---- fc1 (bf16 MXU inputs, f32 accumulation) + ReLU ----------------------
    x = x_ref[...]                                             # (TB, 784) bf16
    h = jnp.dot(x, w1_ref[...], preferred_element_type=jnp.float32)   # (TB, 512) f32
    h = jnp.maximum(h + b1_ref[...], 0.0)                      # b1: (1, 512) f32

    # ---- Dropout (inverted dropout, keep prob = 1 - p) -----------------------
    # Counter-based hash PRNG: key = seed + global element index. Integer threshold
    # compare (no float convert), scale folded into a single multiply.
    if training and p_drop > 0.0:
        tb, hp = h.shape
        row = lax.broadcasted_iota(jnp.int32, h.shape, 0) + pl.program_id(0) * tb
        col = lax.broadcasted_iota(jnp.int32, h.shape, 1)
        idx = (row * hp + col).astype(jnp.uint32)
        s = seed_ref[0].astype(jnp.uint32)
        r = idx + s * jnp.uint32(0x9E3779B9)
        # murmur3-style finalizer (xorshift-multiply), wraps mod 2^32
        r = r ^ (r >> 16)
        r = r * jnp.uint32(0x85EBCA6B)
        r = r ^ (r >> 13)
        r = r * jnp.uint32(0xC2B2AE35)
        r = r ^ (r >> 16)
        r24 = (r >> 8).astype(jnp.int32)                       # uniform in [0, 2^24)
        thresh = jnp.int32(int(round(p_drop * (1 << 24))))
        keep = r24 >= thresh                                   # P(keep) = 1 - p
        h = jnp.where(keep, h * jnp.float32(1.0 / (1.0 - p_drop)), 0.0)

    # ---- fc2 (bf16 MXU inputs, f32 accumulation) ------------------------------
    # Pad-class masking is baked into b2 (pad lanes = -1e30), so no extra mask here.
    logits = jnp.dot(h.astype(jnp.bfloat16), w2_ref[...],
                     preferred_element_type=jnp.float32) + b2_ref[...]   # (TB, 128) f32

    # ---- log_softmax (pad lanes underflow to exp()=0, ignored by max) ---------
    m = jnp.max(logits, axis=1, keepdims=True)
    zc = logits - m
    lse = jnp.log(jnp.sum(jnp.exp(zc), axis=1, keepdims=True))
    out_ref[...] = zc - lse                                    # lane-dense (TB, 128) store


@functools.partial(jax.jit, static_argnames=("p_drop", "training", "block_b"))
def net_forward(x, w1, b1, w2, b2, seed, *, p_drop=0.2, training=False, block_b=1024):
    """x: any shape with 784 trailing elements per row (e.g. (B,1,28,28)).
    w1:(784,500) b1:(500,) w2:(500,10) b2:(10,) -- torch nn.Linear layout transposed."""
    x2 = x.reshape(-1, 784)
    B = x2.shape[0]

    # Batch tile: multiple of 8 sublanes, padded batch is a multiple of the tile.
    B_pad = _round_up(B, 8)
    TB = min(block_b, B_pad)
    B_pad = _round_up(B_pad, TB)

    H, HP = 500, 512      # hidden dim padded to a multiple of 128
    C, CP = 10, 128       # class dim padded to a full lane (lane-dense output)

    if B_pad == B:
        x2p = x2.astype(jnp.bfloat16)
    else:
        x2p = jnp.zeros((B_pad, 784), jnp.bfloat16).at[:B].set(x2.astype(jnp.bfloat16))
    w1p = jnp.zeros((784, HP), jnp.bfloat16).at[:, :H].set(w1.astype(jnp.bfloat16))
    b1p = jnp.zeros((1, HP), jnp.float32).at[:, :H].set(b1.astype(jnp.float32))
    w2p = jnp.zeros((HP, CP), jnp.bfloat16).at[:H, :C].set(w2.astype(jnp.bfloat16))
    # Pad-class logits are forced to -1e30 via the bias (w2 pad cols are zero),
    # so log_softmax inside the kernel needs no explicit class mask.
    b2p = jnp.full((1, CP), -1e30, jnp.float32).at[:, :C].set(b2.astype(jnp.float32))
    seed_arr = jnp.asarray(seed, jnp.int32).reshape((1,))

    kernel = functools.partial(net_kernel, p_drop=p_drop, training=training)

    out = pl.pallas_call(
        kernel,
        out_shape=jax.ShapeDtypeStruct((B_pad, CP), jnp.float32),
        grid=(B_pad // TB,),
        in_specs=[
            pl.BlockSpec(memory_space=pltpu.SMEM),              # seed (scalar)
            pl.BlockSpec((TB, 784), lambda i: (i, 0)),          # x tile (pipelined)
            pl.BlockSpec((784, HP), lambda i: (0, 0)),          # w1 (VMEM-resident)
            pl.BlockSpec((1, HP), lambda i: (0, 0)),            # b1
            pl.BlockSpec((HP, CP), lambda i: (0, 0)),           # w2
            pl.BlockSpec((1, CP), lambda i: (0, 0)),            # b2 (pad lanes = -1e30)
        ],
        out_specs=pl.BlockSpec((TB, CP), lambda i: (i, 0)),
        compiler_params=pltpu.CompilerParams(
            dimension_semantics=("parallel",),
            vmem_limit_bytes=32 * 1024 * 1024),
    )(seed_arr, x2p, w1p, b1p, w2p, b2p)

    return out[:B, :C]


def init_params(key):
    """nn.Linear-style init: U(-1/sqrt(fan_in), 1/sqrt(fan_in)); weights stored (in, out)."""
    k1, k2, k3, k4 = jax.random.split(key, 4)
    bound1 = 1.0 / jnp.sqrt(784.0)
    bound2 = 1.0 / jnp.sqrt(500.0)
    w1 = jax.random.uniform(k1, (784, 500), jnp.float32, -bound1, bound1)
    b1 = jax.random.uniform(k2, (500,), jnp.float32, -bound1, bound1)
    w2 = jax.random.uniform(k3, (500, 10), jnp.float32, -bound2, bound2)
    b2 = jax.random.uniform(k4, (10,), jnp.float32, -bound2, bound2)
    return w1, b1, w2, b2


def reference_forward(x, w1, b1, w2, b2):
    """Pure-JAX eval-mode reference (dropout = identity), same bf16 MXU-input policy."""
    x2 = x.reshape(-1, 784)
    h = jnp.dot(x2.astype(jnp.bfloat16), w1.astype(jnp.bfloat16),
                preferred_element_type=jnp.float32) + b1
    h = jnp.maximum(h, 0.0)
    logits = jnp.dot(h.astype(jnp.bfloat16), w2.astype(jnp.bfloat16),
                     preferred_element_type=jnp.float32) + b2
    return jax.nn.log_softmax(logits, axis=1)


if __name__ == "__main__":
    key = jax.random.PRNGKey(0)
    kx, kp = jax.random.split(key)

    # Small MNIST-like input: (B=2, C=1, H=28, W=28) -> view(-1, 784)
    x = jax.random.normal(kx, (2, 1, 28, 28), jnp.float32)
    w1, b1, w2, b2 = init_params(kp)
    seed = jnp.array([1234], dtype=jnp.int32)

    # Eval mode (deterministic): check against pure-JAX reference.
    out_eval = jax.block_until_ready(
        net_forward(x, w1, b1, w2, b2, seed, training=False))
    ref = reference_forward(x, w1, b1, w2, b2)
    assert out_eval.shape == (2, 10)
    assert jnp.allclose(out_eval, ref, atol=1e-3, rtol=1e-3), "mismatch vs reference"
    # log_softmax rows must exp-sum to 1
    assert jnp.allclose(jnp.sum(jnp.exp(out_eval), axis=1), 1.0, atol=1e-4)

    # Training mode (stochastic dropout path): shape, normalization, and that it differs.
    out_train = jax.block_until_ready(
        net_forward(x, w1, b1, w2, b2, seed, training=True))
    assert out_train.shape == (2, 10)
    assert jnp.allclose(jnp.sum(jnp.exp(out_train), axis=1), 1.0, atol=1e-4)
    assert not jnp.allclose(out_train, out_eval), "dropout had no effect in training mode"

    print("KERNEL_OK")
</pallas_src>

<mosaic_0001>
module attributes {stable_mosaic.version = 11 : i64} {
  func.func @net_kernel(%arg0: i32, %arg1: memref<1xi32, #tpu.memory_space<smem>>, %arg2: memref<8x784xbf16, #tpu.memory_space<vmem>>, %arg3: memref<784x512xbf16, #tpu.memory_space<vmem>>, %arg4: memref<1x512xf32, #tpu.memory_space<vmem>>, %arg5: memref<512x128xbf16, #tpu.memory_space<vmem>>, %arg6: memref<1x128xf32, #tpu.memory_space<vmem>>, %arg7: memref<8x128xf32, #tpu.memory_space<vmem>>) attributes {dimension_semantics = [#tpu.dimension_semantics<parallel>], iteration_bounds = array<i64: 1>, scalar_prefetch = 0 : i64, scratch_operands = 0 : i64, tpu.core_type = #tpu.core_type<tc>, window_params = [{transform_indices = @transform_0, window_bounds = array<i64: 1>}, {transform_indices = @transform_1, window_bounds = array<i64: 8, 784>}, {pipeline_mode = #tpu.pipeline_mode<synchronous>, transform_indices = @transform_2, window_bounds = array<i64: 784, 512>}, {pipeline_mode = #tpu.pipeline_mode<synchronous>, transform_indices = @transform_3, window_bounds = array<i64: 1, 512>}, {pipeline_mode = #tpu.pipeline_mode<synchronous>, transform_indices = @transform_4, window_bounds = array<i64: 512, 128>}, {pipeline_mode = #tpu.pipeline_mode<synchronous>, transform_indices = @transform_5, window_bounds = array<i64: 1, 128>}, {transform_indices = @transform_6, window_bounds = array<i64: 8, 128>}]} {
    %c0 = arith.constant 0 : index
    %c0_0 = arith.constant 0 : index
    %0 = vector.load %arg2[%c0, %c0_0] : memref<8x784xbf16, #tpu.memory_space<vmem>>, vector<8x784xbf16>
    %c0_1 = arith.constant 0 : index
    %c0_2 = arith.constant 0 : index
    %1 = vector.load %arg3[%c0_1, %c0_2] : memref<784x512xbf16, #tpu.memory_space<vmem>>, vector<784x512xbf16>
    %cst = arith.constant dense<0.000000e+00> : vector<8x512xf32>
    %2 = tpu.matmul %0, %1, %cst {dimension_numbers = #tpu.dot_dimension_numbers<[1], [0], [0], [1], [0, 0, 1, 1], [], []>} : vector<8x784xbf16>, vector<784x512xbf16>, vector<8x512xf32> -> vector<8x512xf32>
    %c0_3 = arith.constant 0 : index
    %c0_4 = arith.constant 0 : index
    %3 = vector.load %arg4[%c0_3, %c0_4] : memref<1x512xf32, #tpu.memory_space<vmem>>, vector<1x512xf32>
    %4 = vector.broadcast %3 : vector<1x512xf32> to vector<8x512xf32>
    %5 = arith.addf %2, %4 : vector<8x512xf32>
    %cst_5 = arith.constant 0.000000e+00 : f32
    %6 = vector.broadcast %cst_5 : f32 to vector<8x512xf32>
    %7 = arith.maximumf %5, %6 : vector<8x512xf32>
    %8 = arith.truncf %7 : vector<8x512xf32> to vector<8x512xbf16>
    %c0_6 = arith.constant 0 : index
    %c0_7 = arith.constant 0 : index
    %9 = vector.load %arg5[%c0_6, %c0_7] : memref<512x128xbf16, #tpu.memory_space<vmem>>, vector<512x128xbf16>
    %cst_8 = arith.constant dense<0.000000e+00> : vector<8x128xf32>
    %10 = tpu.matmul %8, %9, %cst_8 {dimension_numbers = #tpu.dot_dimension_numbers<[1], [0], [0], [1], [0, 0, 1, 1], [], []>} : vector<8x512xbf16>, vector<512x128xbf16>, vector<8x128xf32> -> vector<8x128xf32>
    %c0_9 = arith.constant 0 : index
    %c0_10 = arith.constant 0 : index
    %11 = vector.load %arg6[%c0_9, %c0_10] : memref<1x128xf32, #tpu.memory_space<vmem>>, vector<1x128xf32>
    %12 = vector.broadcast %11 : vector<1x128xf32> to vector<8x128xf32>
    %13 = arith.addf %10, %12 : vector<8x128xf32>
    %cst_11 = arith.constant dense<0xFF800000> : vector<8xf32>
    %14 = vector.multi_reduction <maximumf>, %13, %cst_11 [1] : vector<8x128xf32> to vector<8xf32>
    %15 = vector.shape_cast %14 : vector<8xf32> to vector<8x1xf32>
    %16 = vector.broadcast %15 : vector<8x1xf32> to vector<8x128xf32>
    %17 = arith.subf %13, %16 : vector<8x128xf32>
    %18 = math.exp %17 : vector<8x128xf32>
    %cst_12 = arith.constant dense<0.000000e+00> : vector<8xf32>
    %19 = vector.multi_reduction <add>, %18, %cst_12 [1] : vector<8x128xf32> to vector<8xf32>
    %20 = vector.shape_cast %19 : vector<8xf32> to vector<8x1xf32>
    %21 = math.log %20 : vector<8x1xf32>
    %22 = vector.broadcast %21 : vector<8x1xf32> to vector<8x128xf32>
    %23 = arith.subf %17, %22 : vector<8x128xf32>
    %c0_13 = arith.constant 0 : index
    %c0_14 = arith.constant 0 : index
    %24 = vector.load %arg7[%c0_13, %c0_14] : memref<8x128xf32, #tpu.memory_space<vmem>>, vector<8x128xf32>
    tpu.vector_store %arg7[%c0_13, %c0_14], %23 {strides = array<i32>} : memref<8x128xf32, #tpu.memory_space<vmem>>, vector<8x128xf32>,
    return
  }
  func.func @transform_0(%arg0: i32) -> i32 {
    %c0_i32 = arith.constant 0 : i32
    %c0_i32_0 = arith.constant 0 : i32
    return %c0_i32 : i32
  }
  func.func @transform_1(%arg0: i32) -> (i32, i32) {
    %c0_i32 = arith.constant 0 : i32
    %c0_i32_0 = arith.constant 0 : i32
    return %arg0, %c0_i32 : i32, i32
  }
  func.func @transform_2(%arg0: i32) -> (i32, i32) {
    %c0_i32 = arith.constant 0 : i32
    %c0_i32_0 = arith.constant 0 : i32
    %c0_i32_1 = arith.constant 0 : i32
    return %c0_i32, %c0_i32_0 : i32, i32
  }
  func.func @transform_3(%arg0: i32) -> (i32, i32) {
    %c0_i32 = arith.constant 0 : i32
    %c0_i32_0 = arith.constant 0 : i32
    %c0_i32_1 = arith.constant 0 : i32
    return %c0_i32, %c0_i32_0 : i32, i32
  }
  func.func @transform_4(%arg0: i32) -> (i32, i32) {
    %c0_i32 = arith.constant 0 : i32
    %c0_i32_0 = arith.constant 0 : i32
    %c0_i32_1 = arith.constant 0 : i32
    return %c0_i32, %c0_i32_0 : i32, i32
  }
  func.func @transform_5(%arg0: i32) -> (i32, i32) {
    %c0_i32 = arith.constant 0 : i32
    %c0_i32_0 = arith.constant 0 : i32
    %c0_i32_1 = arith.constant 0 : i32
    return %c0_i32, %c0_i32_0 : i32, i32
  }
  func.func @transform_6(%arg0: i32) -> (i32, i32) {
    %c0_i32 = arith.constant 0 : i32
    %c0_i32_0 = arith.constant 0 : i32
    return %arg0, %c0_i32 : i32, i32
  }
}

</mosaic_0001>

<bundles_post_ra>
// kernel: net_forward.1
= control target key start
LH: loop header
LB: loop body
LE: loop exit
PB: predicated region body
PF: predicated region fallthrough
CT: control target
= control target key end

     0   :  { %vm1239_vm0 = vcmask 130048   ;;  %s4483_s0 = inlined_call_operand.<no memory space> [shape: s32[1], index: 0, kind: input, shape index: {}]   ;;  %s4484_s2 = inlined_call_operand.vmem [shape: bf16[784,512], index: 2, kind: input, shape index: {}]   ;;  %s4485_s1 = inlined_call_operand.vmem [shape: bf16[8,784], index: 1, kind: input, shape index: {}]   ;;  %s4486_s3 = inlined_call_operand.vmem [shape: f32[1,512], index: 3, kind: input, shape index: {}]   ;;  %s4487_s4 = inlined_call_operand.vmem [shape: bf16[512,128], index: 4, kind: input, shape index: {}]   ;;  %s4488_s5 = inlined_call_operand.vmem [shape: f32[1,128], index: 5, kind: input, shape index: {}]   ;;  %s4489_s6 = inlined_call_operand.vmem [shape: f32[8,128], index: 6, kind: output, shape index: {}]  }
   0x1   :  { %v2056_v0 = vld [vmem:[%s4484_s2 + $0xe0] sm:$0xf]  ;;  %v2888_v1 = vld [vmem:[%s4484_s2 + $0xec] sm:$0xf0] }
   0x2   :  { %v2184_v2 = vld [vmem:[%s4484_s2 + $0x1e0] sm:$0xf]  ;;  %v2057_v3 = vor.u32 %v2888_v1, %v2056_v0  ;;  %v2920_v4 = vld [vmem:[%s4484_s2 + $0x1ec] sm:$0xf0] }
   0x3   :  { %v2312_v5 = vld [vmem:[%s4484_s2 + $0x2e0] sm:$0xf]  ;;  %v2952_v6 = vld [vmem:[%s4484_s2 + $0x2ec] sm:$0xf0]  ;;  %v2185_v7 = vor.u32 %v2920_v4, %v2184_v2 }
   0x4   :  { %v2313_v8 = vor.u32 %v2952_v6, %v2312_v5  ;;  %v2440_v9 = vld [vmem:[%s4484_s2 + $0x3e0] sm:$0xf]  ;;  %v2984_v10 = vld [vmem:[%s4484_s2 + $0x3ec] sm:$0xf0]  ;;  %1243 = vmatpush.bf16.msra.mxu0 %v2057_v3 }
   0x5   :  { %v2040_v11 = vld [vmem:[%s4484_s2 + $0xc0] sm:$0xf]  ;;  %v2441_v12 = vor.u32 %v2984_v10, %v2440_v9  ;;  %v2884_v13 = vld [vmem:[%s4484_s2 + $0xcc] sm:$0xf0]  ;;  %1256 = vmatpush.bf16.msra.mxu1 %v2185_v7 }
   0x6   :  { %v2168_v14 = vld [vmem:[%s4484_s2 + $0x1c0] sm:$0xf]  ;;  %v2916_v15 = vld [vmem:[%s4484_s2 + $0x1cc] sm:$0xf0]  ;;  %1269 = vmatpush.bf16.msra.mxu2 %v2313_v8  ;;  %v2041_v16 = vor.u32 %v2884_v13, %v2040_v11 }
   0x7   :  { %v2169_v17 = vor.u32 %v2916_v15, %v2168_v14  ;;  %v2296_v18 = vld [vmem:[%s4484_s2 + $0x2c0] sm:$0xf]  ;;  %v2948_v19 = vld [vmem:[%s4484_s2 + $0x2cc] sm:$0xf0]  ;;  %1282 = vmatpush.bf16.msra.mxu3 %v2441_v12 }
   0x8   :  { %v2424_v20 = vld [vmem:[%s4484_s2 + $0x3c0] sm:$0xf]  ;;  %v2297_v21 = vor.u32 %v2948_v19, %v2296_v18  ;;  %v2980_v22 = vld [vmem:[%s4484_s2 + $0x3cc] sm:$0xf0]  ;;  %1244 = vmatpush.bf16.msra.mxu0 %v2041_v16 }
   0x9   :  { %v2024_v23 = vld [vmem:[%s4484_s2 + $0xa0] sm:$0xf]  ;;  %v2880_v24 = vld [vmem:[%s4484_s2 + $0xac] sm:$0xf0]  ;;  %v2425_v25 = vor.u32 %v2980_v22, %v2424_v20  ;;  %1257 = vmatpush.bf16.msra.mxu1 %v2169_v17 }
   0xa   :  { %v2152_v26 = vld [vmem:[%s4484_s2 + $0x1a0] sm:$0xf]  ;;  %v2912_v27 = vld [vmem:[%s4484_s2 + $0x1ac] sm:$0xf0]  ;;  %v2025_v29 = vor.u32 %v2880_v24, %v2024_v23  ;;  %1270 = vmatpush.bf16.msra.mxu2 %v2297_v21 }
   0xb   :  { %v2280_v28 = vld [vmem:[%s4484_s2 + $0x2a0] sm:$0xf]  ;;  %v2944_v30 = vld [vmem:[%s4484_s2 + $0x2ac] sm:$0xf0]  ;;  %v2153_v33 = vor.u32 %v2912_v27, %v2152_v26  ;;  %1283 = vmatpush.bf16.msra.mxu3 %v2425_v25  ;;  %v26_v25 = vld [vmem:[%s4485_s1 + $0x8] sm:$0xff] }
   0xc   :  { %v2408_v31 = vld [vmem:[%s4484_s2 + $0x3a0] sm:$0xf]  ;;  %v2976_v32 = vld [vmem:[%s4484_s2 + $0x3ac] sm:$0xf0]  ;;  %v2281_v34 = vor.u32 %v2944_v30, %v2280_v28  ;;  %1245 = vmatpush.bf16.msra.mxu0 %v2025_v29 }
   0xd   :  { %v2008_v35 = vld [vmem:[%s4484_s2 + $0x80] sm:$0xf]  ;;  %v2876_v36 = vld [vmem:[%s4484_s2 + $0x8c] sm:$0xf0]  ;;  %v2409_v38 = vor.u32 %v2976_v32, %v2408_v31  ;;  %1258 = vmatpush.bf16.msra.mxu1 %v2153_v33 }
   0xe   :  { %v2136_v37 = vld [vmem:[%s4484_s2 + $0x180] sm:$0xf]  ;;  %v2908_v39 = vld [vmem:[%s4484_s2 + $0x18c] sm:$0xf0]  ;;  %v2009_v44 = vor.u32 %v2876_v36, %v2008_v35  ;;  %1271 = vmatpush.bf16.msra.mxu2 %v2281_v34  ;;  %v2886_v34 = vld [vmem:[%s4484_s2 + $0xe4] sm:$0xf]  ;;  %v241_v36 = vunpack.c.l.b16 %v26_v25 }
   0xf   :  { %v2264_v40 = vld [vmem:[%s4484_s2 + $0x280] sm:$0xf]  ;;  %v2940_v41 = vld [vmem:[%s4484_s2 + $0x28c] sm:$0xf0]  ;;  %v2137_v45 = vor.u32 %v2908_v39, %v2136_v37  ;;  %1284 = vmatpush.bf16.msra.mxu3 %v2409_v38  ;;  %v2058_v35 = vld [vmem:[%s4484_s2 + $0xf0] sm:$0xf0] }
  0x10   :  { %v2392_v42 = vld [vmem:[%s4484_s2 + $0x380] sm:$0xf]  ;;  %v2972_v43 = vld [vmem:[%s4484_s2 + $0x38c] sm:$0xf0]  ;;  %v2265_v46 = vor.u32 %v2940_v41, %v2264_v40  ;;  %1246 = vmatpush.bf16.msra.mxu0 %v2009_v44 }
  0x11   :  { %v1992_v47 = vld [vmem:[%s4484_s2 + $0x60] sm:$0xf]  ;;  %v2872_v48 = vld [vmem:[%s4484_s2 + $0x6c] sm:$0xf0]  ;;  %v2393_v50 = vor.u32 %v2972_v43, %v2392_v42  ;;  %1259 = vmatpush.bf16.msra.mxu1 %v2137_v45  ;;  %v242_v42 = vunpack.c.h.b16 %v26_v25  ;;  %v2906_v25 = vld [vmem:[%s4484_s2 + $0x184] sm:$0xf] }
  0x12   :  { %v2120_v49 = vld [vmem:[%s4484_s2 + $0x160] sm:$0xf]  ;;  %v2904_v51 = vld [vmem:[%s4484_s2 + $0x16c] sm:$0xf0]  ;;  %v1993_v56 = vor.u32 %v2872_v48, %v1992_v47  ;;  %1272 = vmatpush.bf16.msra.mxu2 %v2265_v46  ;;  %v2918_v46 = vld [vmem:[%s4484_s2 + $0x1e4] sm:$0xf] }
  0x13   :  { %v2248_v52 = vld [vmem:[%s4484_s2 + $0x260] sm:$0xf]  ;;  %v2936_v53 = vld [vmem:[%s4484_s2 + $0x26c] sm:$0xf0]  ;;  %v2121_v57 = vor.u32 %v2904_v51, %v2120_v49  ;;  %1285 = vmatpush.bf16.msra.mxu3 %v2393_v50  ;;  %v2186_v47 = vld [vmem:[%s4484_s2 + $0x1f0] sm:$0xf0]  ;;  %v2061_v49 = vor.u32 %v2886_v34, %v2058_v35 }
  0x14   :  { %v2376_v54 = vld [vmem:[%s4484_s2 + $0x360] sm:$0xf]  ;;  %v2968_v55 = vld [vmem:[%s4484_s2 + $0x36c] sm:$0xf0]  ;;  %v2249_v58 = vor.u32 %v2936_v53, %v2248_v52  ;;  %1247 = vmatpush.bf16.msra.mxu0 %v1993_v56  ;;  %v3363_v53 = vpack.c.b16 %v241_v36, %v241_v36  ;;  %v2042_v56 = vld [vmem:[%s4484_s2 + $0xd0] sm:$0xf0] }
  0x15   :  { %v1976_v59 = vld [vmem:[%s4484_s2 + $0x40] sm:$0xf]  ;;  %v2868_v60 = vld [vmem:[%s4484_s2 + $0x4c] sm:$0xf0]  ;;  %v2377_v62 = vor.u32 %v2968_v55, %v2376_v54  ;;  %1260 = vmatpush.bf16.msra.mxu1 %v2121_v57  ;;  %v2882_v55 = vld [vmem:[%s4484_s2 + $0xc4] sm:$0xf] }
  0x16   :  { %v2104_v61 = vld [vmem:[%s4484_s2 + $0x140] sm:$0xf]  ;;  %v2900_v63 = vld [vmem:[%s4484_s2 + $0x14c] sm:$0xf0]  ;;  %v1977_v4 = vor.u32 %v2868_v60, %v1976_v59  ;;  %1273 = vmatpush.bf16.msra.mxu2 %v2249_v58  ;;  %v3376_v60 = vpack.c.b16 %v242_v42, %v242_v42  ;;  %v1994_v34 = vld [vmem:[%s4484_s2 + $0x70] sm:$0xf0] }
  0x17   :  { %v2232_v0 = vld [vmem:[%s4484_s2 + $0x240] sm:$0xf]  ;;  %v2932_v1 = vld [vmem:[%s4484_s2 + $0x24c] sm:$0xf0]  ;;  %v2105_v5 = vor.u32 %v2900_v63, %v2104_v61  ;;  %1286 = vmatpush.bf16.msra.mxu3 %v2377_v62  ;;  %v2189_v61 = vor.u32 %v2918_v46, %v2186_v47  ;;  %v2914_v63 = vld [vmem:[%s4484_s2 + $0x1c4] sm:$0xf] }
  0x18   :  { %v2360_v2 = vld [vmem:[%s4484_s2 + $0x340] sm:$0xf]  ;;  %v2964_v3 = vld [vmem:[%s4484_s2 + $0x34c] sm:$0xf0]  ;;  %v2233_v6 = vor.u32 %v2932_v1, %v2232_v0  ;;  %1248 = vmatpush.bf16.msra.mxu0 %v1977_v4  ;;  %v2170_v0 = vld [vmem:[%s4484_s2 + $0x1d0] sm:$0xf0] }
  0x19   :  { %v1960_v7 = vld [vmem:[%s4484_s2 + $0x20] sm:$0xf]  ;;  %v2864_v8 = vld [vmem:[%s4484_s2 + $0x2c] sm:$0xf0]  ;;  %v2361_v10 = vor.u32 %v2964_v3, %v2360_v2  ;;  %1261 = vmatpush.bf16.msra.mxu1 %v2105_v5  ;;  %v2045_v2 = vor.u32 %v2882_v55, %v2042_v56  ;;  %v2866_v46 = vld [vmem:[%s4484_s2 + $0x44] sm:$0xf] }
  0x1a   :  { %v2088_v9 = vld [vmem:[%s4484_s2 + $0x120] sm:$0xf]  ;;  %v2896_v11 = vld [vmem:[%s4484_s2 + $0x12c] sm:$0xf0]  ;;  %v1961_v17 = vor.u32 %v2864_v8, %v1960_v7  ;;  %1274 = vmatpush.bf16.msra.mxu2 %v2233_v6  ;;  %v2878_v7 = vld [vmem:[%s4484_s2 + $0xa4] sm:$0xf] }
  0x1b   :  { %v2216_v12 = vld [vmem:[%s4484_s2 + $0x220] sm:$0xf]  ;;  %v2928_v13 = vld [vmem:[%s4484_s2 + $0x22c] sm:$0xf0]  ;;  %v2089_v21 = vor.u32 %v2896_v11, %v2088_v9  ;;  %1287 = vmatpush.bf16.msra.mxu3 %v2361_v10  ;;  %v2026_v8 = vld [vmem:[%s4484_s2 + $0xb0] sm:$0xf0]  ;;  %v2173_v10 = vor.u32 %v2914_v63, %v2170_v0 }
  0x1c   :  { %v2344_v14 = vld [vmem:[%s4484_s2 + $0x320] sm:$0xf]  ;;  %v2960_v15 = vld [vmem:[%s4484_s2 + $0x32c] sm:$0xf0]  ;;  %v2217_v22 = vor.u32 %v2928_v13, %v2216_v12  ;;  %1249 = vmatpush.bf16.msra.mxu0 %v1961_v17  ;;  %v2910_v12 = vld [vmem:[%s4484_s2 + $0x1a4] sm:$0xf] }
  0x1d   :  { %v1944_v16 = vld [vmem:[%s4484_s2] sm:$0xf]  ;;  %v2860_v18 = vld [vmem:[%s4484_s2 + $0xc] sm:$0xf0]  ;;  %v2345_v26 = vor.u32 %v2960_v15, %v2344_v14  ;;  %1262 = vmatpush.bf16.msra.mxu1 %v2089_v21  ;;  %v2154_v13 = vld [vmem:[%s4484_s2 + $0x1b0] sm:$0xf0]  ;;  %v2029_v15 = vor.u32 %v2878_v7, %v2026_v8 }
  0x1e   :  { %v2072_v19 = vld [vmem:[%s4484_s2 + $0x100] sm:$0xf]  ;;  %v2892_v20 = vld [vmem:[%s4484_s2 + $0x10c] sm:$0xf0]  ;;  %v1945_v33 = vor.u32 %v2860_v18, %v1944_v16  ;;  %1275 = vmatpush.bf16.msra.mxu2 %v2217_v22  ;;  %v2010_v21 = vld [vmem:[%s4484_s2 + $0x90] sm:$0xf0] }
  0x1f   :  { %v2200_v23 = vld [vmem:[%s4484_s2 + $0x200] sm:$0xf]  ;;  %v2924_v24 = vld [vmem:[%s4484_s2 + $0x20c] sm:$0xf0]  ;;  %v2073_v38 = vor.u32 %v2892_v20, %v2072_v19  ;;  %1288 = vmatpush.bf16.msra.mxu3 %v2345_v26  ;;  %v2874_v20 = vld [vmem:[%s4484_s2 + $0x84] sm:$0xf] }
  0x20   :  { %v2328_v27 = vld [vmem:[%s4484_s2 + $0x300] sm:$0xf]  ;;  %v2956_v28 = vld [vmem:[%s4484_s2 + $0x30c] sm:$0xf0]  ;;  %v2201_v39 = vor.u32 %v2924_v24, %v2200_v23  ;;  %1250 = vmatpush.bf16.msra.mxu0 %v1945_v33  ;;  %v28_v22 = vld [vmem:[%s4485_s1 + $0x18] sm:$0xf]  ;;  %v2157_v23 = vor.u32 %v2910_v12, %v2154_v13 }
  0x21   :  { %v2568_v29 = vld [vmem:[%s4484_s2 + $0x4e0] sm:$0xf]  ;;  %v3016_v30 = vld [vmem:[%s4484_s2 + $0x4ec] sm:$0xf0]  ;;  %v2329_v43 = vor.u32 %v2956_v28, %v2328_v27  ;;  %1263 = vmatpush.bf16.msra.mxu1 %v2073_v38  ;;  %v2138_v26 = vld [vmem:[%s4484_s2 + $0x190] sm:$0xf0]  ;;  %v2013_v28 = vor.u32 %v2874_v20, %v2010_v21  ;;  %v245_v35 = vunpack.c.l.b16 %v28_v22 }
  0x22   :  { %v2696_v31 = vld [vmem:[%s4484_s2 + $0x5e0] sm:$0xf]  ;;  %v3048_v32 = vld [vmem:[%s4484_s2 + $0x5ec] sm:$0xf0]  ;;  %v2569_v44 = vor.u32 %v3016_v30, %v2568_v29  ;;  %1276 = vmatpush.bf16.msra.mxu2 %v2201_v39  ;;  %v2870_v33 = vld [vmem:[%s4484_s2 + $0x64] sm:$0xf]  ;;  %v2141_v36 = vor.u32 %v2906_v25, %v2138_v26 }
  0x23   :  { %v25_v37 = vld [vmem:[%s4485_s1] sm:$0xff]  ;;  %v3052_v45 = vld [vmem:[%s4484_s2 + $0x60c] sm:$0xf0]  ;;  %v2697_v48 = vor.u32 %v3048_v32, %v2696_v31  ;;  %1289 = vmatpush.bf16.msra.mxu3 %v2329_v43  ;;  %v2122_v39 = vld [vmem:[%s4484_s2 + $0x170] sm:$0xf0] }
  0x24   :  { %v2712_v40 = vld [vmem:[%s4484_s2 + $0x600] sm:$0xf]  ;;  %v239_v41 = vunpack.c.l.b16 %v25_v37  ;;  %v3012_v51 = vld [vmem:[%s4484_s2 + $0x4cc] sm:$0xf0]  ;;  %v240_v58 = vunpack.c.h.b16 %v25_v37  ;;  %1295 = vmatpush.bf16.msrb.mxu0 %v2569_v44  ;;  %v2902_v38 = vld [vmem:[%s4484_s2 + $0x164] sm:$0xf] }
  0x25   :  { %v2552_v50 = vld [vmem:[%s4484_s2 + $0x4c0] sm:$0xf]  ;;  %v3044_v54 = vld [vmem:[%s4484_s2 + $0x5cc] sm:$0xf0]  ;;  %v2713_v59 = vor.u32 %v3052_v45, %v2712_v40  ;;  %1308 = vmatpush.bf16.msrb.mxu1 %v2697_v48  ;;  %1277 = vmatmul.bf16.vlgmr.msra.gmra.mxu2 %v3363_v53  ;;  %v1978_v47 = vld [vmem:[%s4484_s2 + $0x50] sm:$0xf0]  ;;  %v3483_v48 = vpack.c.b16 %v245_v35, %v245_v35 }
  0x26   :  { %v2680_v52 = vld [vmem:[%s4484_s2 + $0x5c0] sm:$0xf]  ;;  %v3374_v57 = vpack.c.b16 %v239_v41, %v239_v41  ;;  %v2553_v62 = vor.u32 %v3012_v51, %v2552_v50  ;;  %v3008_v4 = vld [vmem:[%s4484_s2 + $0x4ac] sm:$0xf0]  ;;  %v3404_v9 = vpack.c.b16 %v240_v58, %v240_v58  ;;  %1290 = vmatmul.bf16.vlgmr.msra.gmra.mxu3 %v3376_v60  ;;  %v1997_v41 = vor.u32 %v2870_v33, %v1994_v34  ;;  %v2898_v51 = vld [vmem:[%s4484_s2 + $0x144] sm:$0xf] }
  0x27   :  { %1334 = vmatpush.bf16.msrb.mxu3 %v2061_v49  ;;  %v2681_v1 = vor.u32 %v3044_v54, %v2680_v52  ;;  %v2536_v3 = vld [vmem:[%s4484_s2 + $0x4a0] sm:$0xf]  ;;  %v3040_v6 = vld [vmem:[%s4484_s2 + $0x5ac] sm:$0xf0]  ;;  %1328 = vmatpush.bf16.msrb.mxu2 %v2713_v59  ;;  %v2125_v49 = vor.u32 %v2902_v38, %v2122_v39  ;;  %v2106_v52 = vld [vmem:[%s4484_s2 + $0x150] sm:$0xf0]  ;;  %v1981_v55 = vor.u32 %v2866_v46, %v1978_v47 }
  0x28   :  { %v2664_v5 = vld [vmem:[%s4484_s2 + $0x5a0] sm:$0xf]  ;;  %1251 = vmatmul.bf16.vlgmr.msra.gmra.mxu0 %v3374_v57  ;;  %v2537_v11 = vor.u32 %v3008_v4, %v2536_v3  ;;  %v3004_v17 = vld [vmem:[%s4484_s2 + $0x48c] sm:$0xf0]  ;;  %1264 = vmatmul.bf16.vlgmr.msra.gmra.mxu1 %v3404_v9  ;;  %v1962_v63 = vld [vmem:[%s4484_s2 + $0x30] sm:$0xf0] }
  0x29   :  { %1296 = vmatpush.bf16.msrb.mxu0 %v2553_v62  ;;  %1309 = vmatpush.bf16.msrb.mxu1 %v2681_v1  ;;  %v2665_v14 = vor.u32 %v3040_v6, %v2664_v5  ;;  %v2520_v16 = vld [vmem:[%s4484_s2 + $0x480] sm:$0xf]  ;;  %v3036_v19 = vld [vmem:[%s4484_s2 + $0x58c] sm:$0xf0]  ;;  %v2862_v62 = vld [vmem:[%s4484_s2 + $0x24] sm:$0xf]  ;;  %v2109_v1 = vor.u32 %v2898_v51, %v2106_v52 }
  0x2a   :  { %v2648_v18 = vld [vmem:[%s4484_s2 + $0x580] sm:$0xf]  ;;  %v2521_v24 = vor.u32 %v3004_v17, %v2520_v16  ;;  %v3000_v30 = vld [vmem:[%s4484_s2 + $0x46c] sm:$0xf0]  ;;  %v2894_v0 = vld [vmem:[%s4484_s2 + $0x124] sm:$0xf]  ;;  %v1965_v7 = vor.u32 %v2862_v62, %v1962_v63 }
  0x2b   :  { %1347 = vmatpush.bf16.msra.mxu2 %v2189_v61  ;;  %1335 = vmatpush.bf16.msrb.mxu3 %v2045_v2  ;;  %v2649_v27 = vor.u32 %v3036_v19, %v2648_v18  ;;  %v2504_v29 = vld [vmem:[%s4484_s2 + $0x460] sm:$0xf]  ;;  %v3032_v32 = vld [vmem:[%s4484_s2 + $0x56c] sm:$0xf0]  ;;  %v2090_v3 = vld [vmem:[%s4484_s2 + $0x130] sm:$0xf0] }
  0x2c   :  { %v2632_v31 = vld [vmem:[%s4484_s2 + $0x560] sm:$0xf]  ;;  %v2505_v37 = vor.u32 %v3000_v30, %v2504_v29  ;;  %v2996_v43 = vld [vmem:[%s4484_s2 + $0x44c] sm:$0xf0]  ;;  %v2858_v12 = vld [vmem:[%s4484_s2 + $0x4] sm:$0xf]  ;;  %v2093_v19 = vor.u32 %v2894_v0, %v2090_v3 }
  0x2d   :  { %1297 = vmatpush.bf16.msrb.mxu0 %v2537_v11  ;;  %1310 = vmatpush.bf16.msrb.mxu1 %v2665_v14  ;;  %v2633_v40 = vor.u32 %v3032_v32, %v2632_v31  ;;  %v2488_v42 = vld [vmem:[%s4484_s2 + $0x440] sm:$0xf]  ;;  %v3028_v45 = vld [vmem:[%s4484_s2 + $0x54c] sm:$0xf0]  ;;  %v1946_v13 = vld [vmem:[%s4484_s2 + $0x10] sm:$0xf0] }
  0x2e   :  { %v2616_v44 = vld [vmem:[%s4484_s2 + $0x540] sm:$0xf]  ;;  %v2489_v50 = vor.u32 %v2996_v43, %v2488_v42  ;;  %v2992_v58 = vld [vmem:[%s4484_s2 + $0x42c] sm:$0xf0]  ;;  %v2950_v14 = vld [vmem:[%s4484_s2 + $0x2e4] sm:$0xf]  ;;  %v1949_v25 = vor.u32 %v2858_v12, %v1946_v13 }
  0x2f   :  { %1348 = vmatpush.bf16.msra.mxu2 %v2173_v10  ;;  %1336 = vmatpush.bf16.msrb.mxu3 %v2029_v15  ;;  %v2617_v54 = vor.u32 %v3028_v45, %v2616_v44  ;;  %v2472_v56 = vld [vmem:[%s4484_s2 + $0x420] sm:$0xf]  ;;  %v3024_v61 = vld [vmem:[%s4484_s2 + $0x52c] sm:$0xf0]  ;;  %v2314_v15 = vld [vmem:[%s4484_s2 + $0x2f0] sm:$0xf0] }
  0x30   :  { %v2600_v59 = vld [vmem:[%s4484_s2 + $0x520] sm:$0xf]  ;;  %v2473_v2 = vor.u32 %v2992_v58, %v2472_v56  ;;  %v27_v5 = vld [vmem:[%s4485_s1 + $0x10] sm:$0xff]  ;;  %v2982_v16 = vld [vmem:[%s4484_s2 + $0x3e4] sm:$0xf] }
  0x31   :  { %1298 = vmatpush.bf16.msrb.mxu0 %v2521_v24  ;;  %1311 = vmatpush.bf16.msrb.mxu1 %v2649_v27  ;;  %v2456_v4 = vld [vmem:[%s4484_s2 + $0x400] sm:$0xf]  ;;  %v2601_v6 = vor.u32 %v3024_v61, %v2600_v59  ;;  %v2988_v8 = vld [vmem:[%s4484_s2 + $0x40c] sm:$0xf0]  ;;  %v2442_v17 = vld [vmem:[%s4484_s2 + $0x3f0] sm:$0xf0]  ;;  %v243_v18 = vunpack.c.l.b16 %v27_v5 }
  0x32   :  { %v2584_v10 = vld [vmem:[%s4484_s2 + $0x500] sm:$0xf]  ;;  %v3020_v11 = vld [vmem:[%s4484_s2 + $0x50c] sm:$0xf0]  ;;  %v2457_v20 = vor.u32 %v2988_v8, %v2456_v4  ;;  %v3014_v21 = vld [vmem:[%s4484_s2 + $0x4e4] sm:$0xf]  ;;  %v2445_v29 = vor.u32 %v2982_v16, %v2442_v17 }
  0x33   :  { %1349 = vmatpush.bf16.msra.mxu2 %v2157_v23  ;;  %1337 = vmatpush.bf16.msrb.mxu3 %v2013_v28  ;;  %v2570_v22 = vld [vmem:[%s4484_s2 + $0x4f0] sm:$0xf0]  ;;  %v244_v23 = vunpack.c.h.b16 %v27_v5  ;;  %v2585_v24 = vor.u32 %v3020_v11, %v2584_v10  ;;  %v2890_v26 = vld [vmem:[%s4484_s2 + $0x104] sm:$0xf]  ;;  %v2317_v28 = vor.u32 %v2950_v14, %v2314_v15  ;;  %v3571_v34 = vpack.c.b16 %v243_v18, %v243_v18 }
  0x34   :  { %v2074_v27 = vld [vmem:[%s4484_s2 + $0x110] sm:$0xf0]  ;;  %v3046_v30 = vld [vmem:[%s4484_s2 + $0x5e4] sm:$0xf]  ;;  %v2573_v33 = vor.u32 %v3014_v21, %v2570_v22 }
  0x35   :  { %1299 = vmatpush.bf16.msrb.mxu0 %v2505_v37  ;;  %1312 = vmatpush.bf16.msrb.mxu1 %v2633_v40  ;;  %v2698_v31 = vld [vmem:[%s4484_s2 + $0x5f0] sm:$0xf0]  ;;  %v2946_v32 = vld [vmem:[%s4484_s2 + $0x2c4] sm:$0xf]  ;;  %v2077_v38 = vor.u32 %v2890_v26, %v2074_v27  ;;  %v3582_v39 = vpack.c.b16 %v244_v23, %v244_v23 }
  0x36   :  { %2726 = vmatmul.msk.bf16.vlgmr.msrb.gmra.mxu2 %vm1239_vm0, %v3483_v48  ;;  %v2298_v35 = vld [vmem:[%s4484_s2 + $0x2d0] sm:$0xf0]  ;;  %v3010_v40 = vld [vmem:[%s4484_s2 + $0x4c4] sm:$0xf]  ;;  %v2701_v42 = vor.u32 %v3046_v30, %v2698_v31 }
  0x37   :  { %1350 = vmatpush.bf16.msra.mxu2 %v2141_v36  ;;  %1338 = vmatpush.bf16.msrb.mxu3 %v1997_v41  ;;  %v2978_v36 = vld [vmem:[%s4484_s2 + $0x3c4] sm:$0xf]  ;;  %v2426_v37 = vld [vmem:[%s4484_s2 + $0x3d0] sm:$0xf0]  ;;  %v2301_v43 = vor.u32 %v2946_v32, %v2298_v35 }
  0x38   :  { %v2554_v41 = vld [vmem:[%s4484_s2 + $0x4d0] sm:$0xf0]  ;;  %v2429_v44 = vor.u32 %v2978_v36, %v2426_v37  ;;  %v3042_v45 = vld [vmem:[%s4484_s2 + $0x5c4] sm:$0xf] }
  0x39   :  { %1300 = vmatpush.bf16.msrb.mxu0 %v2489_v50  ;;  %1313 = vmatpush.bf16.msrb.mxu1 %v2617_v54  ;;  %v2682_v46 = vld [vmem:[%s4484_s2 + $0x5d0] sm:$0xf0]  ;;  %v2942_v47 = vld [vmem:[%s4484_s2 + $0x2a4] sm:$0xf] }
  0x3a   :  { %v2282_v50 = vld [vmem:[%s4484_s2 + $0x2b0] sm:$0xf0]  ;;  %v2974_v51 = vld [vmem:[%s4484_s2 + $0x3a4] sm:$0xf]  ;;  %v2685_v56 = vor.u32 %v3042_v45, %v2682_v46 }
  0x3b   :  { %1351 = vmatpush.bf16.msra.mxu2 %v2125_v49  ;;  %1339 = vmatpush.bf16.msrb.mxu3 %v1981_v55  ;;  %v2557_v49 = vor.u32 %v3010_v40, %v2554_v41  ;;  %v2410_v52 = vld [vmem:[%s4484_s2 + $0x3b0] sm:$0xf0]  ;;  %v3006_v54 = vld [vmem:[%s4484_s2 + $0x4a4] sm:$0xf]  ;;  %v2285_v58 = vor.u32 %v2942_v47, %v2282_v50 }
  0x3c   :  { %v2538_v55 = vld [vmem:[%s4484_s2 + $0x4b0] sm:$0xf0]  ;;  %v2413_v59 = vor.u32 %v2974_v51, %v2410_v52  ;;  %v3038_v61 = vld [vmem:[%s4484_s2 + $0x5a4] sm:$0xf] }
  0x3d   :  { %1301 = vmatpush.bf16.msrb.mxu0 %v2473_v2  ;;  %1314 = vmatpush.bf16.msrb.mxu1 %v2601_v6  ;;  %v2666_v62 = vld [vmem:[%s4484_s2 + $0x5b0] sm:$0xf0]  ;;  %v2938_v63 = vld [vmem:[%s4484_s2 + $0x284] sm:$0xf]  ;;  %v2541_v0 = vor.u32 %v3006_v54, %v2538_v55 }
  0x3e   :  { %v2970_v2 = vld [vmem:[%s4484_s2 + $0x384] sm:$0xf]  ;;  %v2394_v3 = vld [vmem:[%s4484_s2 + $0x390] sm:$0xf0]  ;;  %v2669_v6 = vor.u32 %v3038_v61, %v2666_v62  ;;  %v2064_v61 = vld [vmem:[%s4484_s2 + $0xe8] sm:$0xf] }
  0x3f   :  { %1352 = vmatpush.bf16.msra.mxu2 %v2109_v1  ;;  %1340 = vmatpush.bf16.msrb.mxu3 %v1965_v7  ;;  %v2266_v1 = vld [vmem:[%s4484_s2 + $0x290] sm:$0xf0]  ;;  %v3002_v4 = vld [vmem:[%s4484_s2 + $0x484] sm:$0xf]  ;;  %v2397_v8 = vor.u32 %v2970_v2, %v2394_v3  ;;  %v2889_v62 = vld [vmem:[%s4484_s2 + $0xf4] sm:$0xf0] }
  0x40   :  { %v2522_v5 = vld [vmem:[%s4484_s2 + $0x490] sm:$0xf0]  ;;  %v2269_v7 = vor.u32 %v2938_v63, %v2266_v1  ;;  %v3034_v10 = vld [vmem:[%s4484_s2 + $0x584] sm:$0xf]  ;;  %v2320_v2 = vld [vmem:[%s4484_s2 + $0x2e8] sm:$0xf] }
  0x41   :  { %1302 = vmatpush.bf16.msrb.mxu0 %v2457_v20  ;;  %1315 = vmatpush.bf16.msrb.mxu1 %v2585_v24  ;;  %v2650_v11 = vld [vmem:[%s4484_s2 + $0x590] sm:$0xf0]  ;;  %v2934_v12 = vld [vmem:[%s4484_s2 + $0x264] sm:$0xf]  ;;  %v2525_v13 = vor.u32 %v3002_v4, %v2522_v5  ;;  %v2953_v3 = vld [vmem:[%s4484_s2 + $0x2f4] sm:$0xf0] }
  0x42   :  { %v2250_v14 = vld [vmem:[%s4484_s2 + $0x270] sm:$0xf0]  ;;  %v2966_v15 = vld [vmem:[%s4484_s2 + $0x364] sm:$0xf] }
  0x43   :  { %1353 = vmatpush.bf16.msra.mxu2 %v2093_v19  ;;  %1341 = vmatpush.bf16.msrb.mxu3 %v1949_v25  ;;  %v2378_v16 = vld [vmem:[%s4484_s2 + $0x370] sm:$0xf0]  ;;  %v2998_v17 = vld [vmem:[%s4484_s2 + $0x464] sm:$0xf]  ;;  %v2653_v19 = vor.u32 %v3034_v10, %v2650_v11  ;;  %v2253_v20 = vor.u32 %v2934_v12, %v2250_v14  ;;  %v2065_v10 = vor.u32 %v2889_v62, %v2064_v61  ;;  %v2448_v11 = vld [vmem:[%s4484_s2 + $0x3e8] sm:$0xf] }
  0x44   :  { %1303 = vmatmul.bf16.vlgmr.msrb.gmra.mxu0 %v3571_v34  ;;  %1316 = vmatmul.bf16.vlgmr.msrb.gmra.mxu1 %v3582_v39  ;;  %v2506_v18 = vld [vmem:[%s4484_s2 + $0x470] sm:$0xf0]  ;;  %v2381_v21 = vor.u32 %v2966_v15, %v2378_v16  ;;  %v3030_v22 = vld [vmem:[%s4484_s2 + $0x564] sm:$0xf]  ;;  %v2985_v12 = vld [vmem:[%s4484_s2 + $0x3f4] sm:$0xf0]  ;;  %v2321_v16 = vor.u32 %v2953_v3, %v2320_v2 }
  0x45   :  { %1360 = vmatpush.bf16.msra.mxu0 %v2317_v28  ;;  %1373 = vmatpush.bf16.msra.mxu1 %v2445_v29  ;;  %v2634_v23 = vld [vmem:[%s4484_s2 + $0x570] sm:$0xf0]  ;;  %v2930_v24 = vld [vmem:[%s4484_s2 + $0x244] sm:$0xf]  ;;  %v2509_v25 = vor.u32 %v2998_v17, %v2506_v18  ;;  %v2192_v14 = vld [vmem:[%s4484_s2 + $0x1e8] sm:$0xf] }
  0x46   :  { %1342 = vmatmul.bf16.vlgmr.msrb.gmra.mxu3 %v3374_v57  ;;  %v2234_v26 = vld [vmem:[%s4484_s2 + $0x250] sm:$0xf0]  ;;  %v2962_v27 = vld [vmem:[%s4484_s2 + $0x344] sm:$0xf]  ;;  %v2637_v31 = vor.u32 %v3030_v22, %v2634_v23  ;;  %v2921_v15 = vld [vmem:[%s4484_s2 + $0x1f4] sm:$0xf0] }
  0x47   :  { %1386 = vmatpush.bf16.msra.mxu3 %v2573_v33  ;;  %1354 = vmatpush.bf16.msra.mxu2 %v2077_v38  ;;  %v2362_v28 = vld [vmem:[%s4484_s2 + $0x350] sm:$0xf0]  ;;  %v2994_v29 = vld [vmem:[%s4484_s2 + $0x444] sm:$0xf]  ;;  %v2237_v32 = vor.u32 %v2930_v24, %v2234_v26  ;;  %v2048_v18 = vld [vmem:[%s4484_s2 + $0xc8] sm:$0xf]  ;;  %v2193_v23 = vor.u32 %v2921_v15, %v2192_v14 }
  0x48   :  { %v2490_v30 = vld [vmem:[%s4484_s2 + $0x450] sm:$0xf0]  ;;  %v2365_v33 = vor.u32 %v2962_v27, %v2362_v28  ;;  %v3026_v35 = vld [vmem:[%s4484_s2 + $0x544] sm:$0xf]  ;;  %v2949_v22 = vld [vmem:[%s4484_s2 + $0x2d4] sm:$0xf0] }
  0x49   :  { %1361 = vmatpush.bf16.msra.mxu0 %v2301_v43  ;;  %1374 = vmatpush.bf16.msra.mxu1 %v2429_v44  ;;  %v2618_v36 = vld [vmem:[%s4484_s2 + $0x550] sm:$0xf0]  ;;  %v2926_v37 = vld [vmem:[%s4484_s2 + $0x224] sm:$0xf]  ;;  %v2493_v38 = vor.u32 %v2994_v29, %v2490_v30  ;;  %v2432_v24 = vld [vmem:[%s4484_s2 + $0x3c8] sm:$0xf] }
  0x4a   :  { %1355 = vmatmul.bf16.vlgmr.msra.gmra.mxu2 %v3404_v9  ;;  %v2218_v40 = vld [vmem:[%s4484_s2 + $0x230] sm:$0xf0]  ;;  %v2958_v41 = vld [vmem:[%s4484_s2 + $0x324] sm:$0xf]  ;;  %v2621_v45 = vor.u32 %v3026_v35, %v2618_v36  ;;  %v2176_v27 = vld [vmem:[%s4484_s2 + $0x1c8] sm:$0xf] }
  0x4b   :  { %1399 = vmatpush.bf16.msrb.mxu2 %v2701_v42  ;;  %1387 = vmatpush.bf16.msra.mxu3 %v2557_v49  ;;  %v2346_v42 = vld [vmem:[%s4484_s2 + $0x330] sm:$0xf0]  ;;  %v2990_v43 = vld [vmem:[%s4484_s2 + $0x424] sm:$0xf]  ;;  %v2221_v49 = vor.u32 %v2926_v37, %v2218_v40  ;;  %v2917_v28 = vld [vmem:[%s4484_s2 + $0x1d4] sm:$0xf0] }
  0x4c   :  { %v2474_v44 = vld [vmem:[%s4484_s2 + $0x430] sm:$0xf0]  ;;  %v3022_v46 = vld [vmem:[%s4484_s2 + $0x524] sm:$0xf]  ;;  %v2349_v50 = vor.u32 %v2958_v41, %v2346_v42  ;;  %v2032_v30 = vld [vmem:[%s4484_s2 + $0xa8] sm:$0xf]  ;;  %v2177_v36 = vor.u32 %v2917_v28, %v2176_v27 }
  0x4d   :  { %1362 = vmatpush.bf16.msra.mxu0 %v2285_v58  ;;  %1375 = vmatpush.bf16.msra.mxu1 %v2413_v59  ;;  %v2602_v47 = vld [vmem:[%s4484_s2 + $0x530] sm:$0xf0]  ;;  %v2922_v51 = vld [vmem:[%s4484_s2 + $0x204] sm:$0xf]  ;;  %v2477_v55 = vor.u32 %v2990_v43, %v2474_v44  ;;  %v2945_v35 = vld [vmem:[%s4484_s2 + $0x2b4] sm:$0xf0] }
  0x4e   :  { %v2202_v52 = vld [vmem:[%s4484_s2 + $0x210] sm:$0xf0]  ;;  %v2954_v54 = vld [vmem:[%s4484_s2 + $0x304] sm:$0xf]  ;;  %v2416_v37 = vld [vmem:[%s4484_s2 + $0x3a8] sm:$0xf] }
  0x4f   :  { %1400 = vmatpush.bf16.msrb.mxu2 %v2685_v56  ;;  %1388 = vmatpush.bf16.msra.mxu3 %v2541_v0  ;;  %v2330_v56 = vld [vmem:[%s4484_s2 + $0x310] sm:$0xf0]  ;;  %v2986_v58 = vld [vmem:[%s4484_s2 + $0x404] sm:$0xf]  ;;  %v2605_v0 = vor.u32 %v3022_v46, %v2602_v47  ;;  %v2205_v4 = vor.u32 %v2922_v51, %v2202_v52  ;;  %v2160_v41 = vld [vmem:[%s4484_s2 + $0x1a8] sm:$0xf] }
  0x50   :  { %v2458_v59 = vld [vmem:[%s4484_s2 + $0x410] sm:$0xf0]  ;;  %v3050_v63 = vld [vmem:[%s4484_s2 + $0x604] sm:$0xf]  ;;  %v2333_v5 = vor.u32 %v2954_v54, %v2330_v56  ;;  %v2913_v42 = vld [vmem:[%s4484_s2 + $0x1b4] sm:$0xf0] }
  0x51   :  { %1363 = vmatpush.bf16.msra.mxu0 %v2269_v7  ;;  %1376 = vmatpush.bf16.msra.mxu1 %v2397_v8  ;;  %v2714_v1 = vld [vmem:[%s4484_s2 + $0x610] sm:$0xf0]  ;;  %v2461_v8 = vor.u32 %v2986_v58, %v2458_v59  ;;  %v2016_v44 = vld [vmem:[%s4484_s2 + $0x88] sm:$0xf]  ;;  %v2973_v52 = vld [vmem:[%s4484_s2 + $0x394] sm:$0xf0] }
  0x52   :  { %v2586_v7 = vld [vmem:[%s4484_s2 + $0x510] sm:$0xf0]  ;;  %v2272_v47 = vld [vmem:[%s4484_s2 + $0x288] sm:$0xf]  ;;  %v2909_v56 = vld [vmem:[%s4484_s2 + $0x194] sm:$0xf0] }
  0x53   :  { %1401 = vmatpush.bf16.msrb.mxu2 %v2669_v6  ;;  %1389 = vmatpush.bf16.msra.mxu3 %v2525_v13  ;;  %v3018_v6 = vld [vmem:[%s4484_s2 + $0x504] sm:$0xf]  ;;  %v2717_v13 = vor.u32 %v3050_v63, %v2714_v1  ;;  %v2400_v51 = vld [vmem:[%s4484_s2 + $0x388] sm:$0xf]  ;;  %v2873_v61 = vld [vmem:[%s4484_s2 + $0x74] sm:$0xf0] }
  0x54   :  { %v2589_v17 = vor.u32 %v3018_v6, %v2586_v7  ;;  %v2000_v59 = vld [vmem:[%s4484_s2 + $0x68] sm:$0xf]  ;;  %v2401_v62 = vor.u32 %v2973_v52, %v2400_v51  ;;  %v2969_v3 = vld [vmem:[%s4484_s2 + $0x374] sm:$0xf0]  ;;  %v2887_v51 = vld [vmem:[%s4484_s2 + $0xec] sm:$0xf] }
  0x55   :  { %1364 = vmatpush.bf16.msra.mxu0 %v2253_v20  ;;  %1377 = vmatpush.bf16.msra.mxu1 %v2381_v21  ;;  %v2449_v20 = vor.u32 %v2985_v12, %v2448_v11  ;;  %v2304_v21 = vld [vmem:[%s4484_s2 + $0x2c8] sm:$0xf]  ;;  %v2905_v6 = vld [vmem:[%s4484_s2 + $0x174] sm:$0xf0]  ;;  %v2066_v52 = vld [vmem:[%s4484_s2 + $0xf8] sm:$0xf0] }
  0x56   :  { %v2305_v29 = vor.u32 %v2949_v22, %v2304_v21  ;;  %v2256_v63 = vld [vmem:[%s4484_s2 + $0x268] sm:$0xf]  ;;  %v2865_v22 = vld [vmem:[%s4484_s2 + $0x34] sm:$0xf0] }
  0x57   :  { %1402 = vmatpush.bf16.msrb.mxu2 %v2653_v19  ;;  %1390 = vmatpush.bf16.msra.mxu3 %v2509_v25  ;;  %v2885_v19 = vld [vmem:[%s4484_s2 + $0xd4] sm:$0xf0]  ;;  %v2384_v2 = vld [vmem:[%s4484_s2 + $0x368] sm:$0xf] }
  0x58   :  { %v2981_v25 = vld [vmem:[%s4484_s2 + $0x3d4] sm:$0xf0]  ;;  %v2049_v26 = vor.u32 %v2885_v19, %v2048_v18  ;;  %v2385_v11 = vor.u32 %v2969_v3, %v2384_v2  ;;  %v2240_v12 = vld [vmem:[%s4484_s2 + $0x248] sm:$0xf]  ;;  %v2069_v3 = vor.u32 %v2887_v51, %v2066_v52 }
  0x59   :  { %1365 = vmatpush.bf16.msra.mxu0 %v2237_v32  ;;  %1378 = vmatpush.bf16.msra.mxu1 %v2365_v33  ;;  %v2433_v32 = vor.u32 %v2981_v25, %v2432_v24  ;;  %v2288_v33 = vld [vmem:[%s4484_s2 + $0x2a8] sm:$0xf]  ;;  %v2901_v19 = vld [vmem:[%s4484_s2 + $0x154] sm:$0xf0] }
  0x5a   :  { %v2289_v43 = vor.u32 %v2945_v35, %v2288_v33  ;;  %v2368_v15 = vld [vmem:[%s4484_s2 + $0x348] sm:$0xf]  ;;  %v2929_v25 = vld [vmem:[%s4484_s2 + $0x234] sm:$0xf0] }
  0x5b   :  { %1403 = vmatpush.bf16.msrb.mxu2 %v2637_v31  ;;  %1391 = vmatpush.bf16.msra.mxu3 %v2493_v38  ;;  %v2881_v31 = vld [vmem:[%s4484_s2 + $0xb4] sm:$0xf0]  ;;  %v2112_v18 = vld [vmem:[%s4484_s2 + $0x148] sm:$0xf] }
  0x5c   :  { %v2977_v38 = vld [vmem:[%s4484_s2 + $0x3b4] sm:$0xf0]  ;;  %v2033_v40 = vor.u32 %v2881_v31, %v2032_v30  ;;  %v1968_v21 = vld [vmem:[%s4484_s2 + $0x28] sm:$0xf] }
  0x5d   :  { %1366 = vmatpush.bf16.msra.mxu0 %v2221_v49  ;;  %1379 = vmatpush.bf16.msra.mxu1 %v2349_v50  ;;  %v2417_v46 = vor.u32 %v2977_v38, %v2416_v37  ;;  %v2941_v49 = vld [vmem:[%s4484_s2 + $0x294] sm:$0xf0]  ;;  %v2161_v50 = vor.u32 %v2913_v42, %v2160_v41  ;;  %v2224_v24 = vld [vmem:[%s4484_s2 + $0x228] sm:$0xf] }
  0x5e   :  { %v2273_v58 = vor.u32 %v2941_v49, %v2272_v47  ;;  %v2352_v27 = vld [vmem:[%s4484_s2 + $0x328] sm:$0xf]  ;;  %v2961_v28 = vld [vmem:[%s4484_s2 + $0x334] sm:$0xf0]  ;;  %v2225_v33 = vor.u32 %v2929_v25, %v2224_v24 }
  0x5f   :  { %1404 = vmatpush.bf16.msrb.mxu2 %v2621_v45  ;;  %1392 = vmatpush.bf16.msra.mxu3 %v2477_v55  ;;  %v2877_v45 = vld [vmem:[%s4484_s2 + $0x94] sm:$0xf0]  ;;  %v2144_v55 = vld [vmem:[%s4484_s2 + $0x188] sm:$0xf]  ;;  %v2353_v38 = vor.u32 %v2961_v28, %v2352_v27  ;;  %v2162_v27 = vld [vmem:[%s4484_s2 + $0x1b8] sm:$0xf0] }
  0x60   :  { %v2017_v54 = vor.u32 %v2877_v45, %v2016_v44  ;;  %v2145_v1 = vor.u32 %v2909_v56, %v2144_v55  ;;  %v2096_v30 = vld [vmem:[%s4484_s2 + $0x128] sm:$0xf]  ;;  %v2897_v31 = vld [vmem:[%s4484_s2 + $0x134] sm:$0xf0] }
  0x61   :  { %1367 = vmatpush.bf16.msra.mxu0 %v2205_v4  ;;  %1380 = vmatpush.bf16.msra.mxu1 %v2333_v5  ;;  %v2001_v4 = vor.u32 %v2873_v61, %v2000_v59  ;;  %v2128_v5 = vld [vmem:[%s4484_s2 + $0x168] sm:$0xf]  ;;  %v2861_v35 = vld [vmem:[%s4484_s2 + $0x14] sm:$0xf0]  ;;  %v2097_v44 = vor.u32 %v2897_v31, %v2096_v30  ;;  %v2875_v30 = vld [vmem:[%s4484_s2 + $0x8c] sm:$0xf] }
  0x62   :  { %v2129_v14 = vor.u32 %v2905_v6, %v2128_v5  ;;  %v3017_v37 = vld [vmem:[%s4484_s2 + $0x4f4] sm:$0xf0]  ;;  %v2208_v41 = vld [vmem:[%s4484_s2 + $0x208] sm:$0xf]  ;;  %v2883_v5 = vld [vmem:[%s4484_s2 + $0xcc] sm:$0xf] }
  0x63   :  { %1405 = vmatpush.bf16.msrb.mxu2 %v2605_v0  ;;  %1393 = vmatpush.bf16.msra.mxu3 %v2461_v8  ;;  %v2937_v0 = vld [vmem:[%s4484_s2 + $0x274] sm:$0xf0]  ;;  %v1984_v8 = vld [vmem:[%s4484_s2 + $0x48] sm:$0xf]  ;;  %v2050_v6 = vld [vmem:[%s4484_s2 + $0xd8] sm:$0xf0] }
  0x64   :  { %1368 = vmatmul.bf16.vlgmr.msra.gmra.mxu0 %v3363_v53  ;;  %1381 = vmatmul.bf16.vlgmr.msra.gmra.mxu1 %v3376_v60  ;;  %v2257_v7 = vor.u32 %v2937_v0, %v2256_v63  ;;  %v2925_v42 = vld [vmem:[%s4484_s2 + $0x214] sm:$0xf0]  ;;  %v2704_v56 = vld [vmem:[%s4484_s2 + $0x5e8] sm:$0xf]  ;;  %v2919_v0 = vld [vmem:[%s4484_s2 + $0x1ec] sm:$0xf] }
  0x65   :  { %1425 = vmatpush.bf16.msrb.mxu1 %v2065_v10  ;;  %1451 = vmatpush.bf16.msrb.mxu0 %v2321_v16  ;;  %v2869_v10 = vld [vmem:[%s4484_s2 + $0x54] sm:$0xf0]  ;;  %v2209_v55 = vor.u32 %v2925_v42, %v2208_v41  ;;  %v2560_v59 = vld [vmem:[%s4484_s2 + $0x4c8] sm:$0xf]  ;;  %v2018_v31 = vld [vmem:[%s4484_s2 + $0x98] sm:$0xf0] }
  0x66   :  { %1394 = vmatmul.bf16.vlgmr.msra.gmra.mxu3 %v3571_v34  ;;  %v2965_v16 = vld [vmem:[%s4484_s2 + $0x354] sm:$0xf0]  ;;  %v2528_v24 = vld [vmem:[%s4484_s2 + $0x488] sm:$0xf]  ;;  %v2146_v41 = vld [vmem:[%s4484_s2 + $0x198] sm:$0xf0]  ;;  %v2021_v42 = vor.u32 %v2875_v30, %v2018_v31 }
  0x67   :  { %1419 = vmatpush.bf16.msrb.mxu3 %v2717_v13  ;;  %1406 = vmatpush.bf16.msrb.mxu2 %v2589_v17  ;;  %v2933_v13 = vld [vmem:[%s4484_s2 + $0x254] sm:$0xf0]  ;;  %v1985_v17 = vor.u32 %v2869_v10, %v1984_v8  ;;  %v2688_v10 = vld [vmem:[%s4484_s2 + $0x5c8] sm:$0xf]  ;;  %v2450_v30 = vld [vmem:[%s4484_s2 + $0x3f8] sm:$0xf0] }
  0x68   :  { %v2957_v45 = vld [vmem:[%s4484_s2 + $0x314] sm:$0xf0]  ;;  %v2496_v51 = vld [vmem:[%s4484_s2 + $0x448] sm:$0xf] }
  0x69   :  { %1426 = vmatpush.bf16.msrb.mxu1 %v2049_v26  ;;  %1452 = vmatpush.bf16.msrb.mxu0 %v2305_v29  ;;  %v2113_v26 = vor.u32 %v2901_v19, %v2112_v18  ;;  %v1969_v29 = vor.u32 %v2865_v22, %v1968_v21  ;;  %v3053_v47 = vld [vmem:[%s4484_s2 + $0x614] sm:$0xf0]  ;;  %v2879_v18 = vld [vmem:[%s4484_s2 + $0xac] sm:$0xf]  ;;  %v2034_v19 = vld [vmem:[%s4484_s2 + $0xb8] sm:$0xf0] }
  0x6a   :  { %1407 = vmatmul.bf16.vlgmr.msrb.gmra.mxu2 %v3582_v39  ;;  %v2672_v22 = vld [vmem:[%s4484_s2 + $0x5a8] sm:$0xf]  ;;  %v3005_v25 = vld [vmem:[%s4484_s2 + $0x494] sm:$0xf0]  ;;  %v2037_v28 = vor.u32 %v2879_v18, %v2034_v19  ;;  %v2098_v18 = vld [vmem:[%s4484_s2 + $0x138] sm:$0xf0] }
  0x6b   :  { %1464 = vmatpush.bf16.msra.mxu2 %v2449_v20  ;;  %1438 = vmatpush.bf16.msra.mxu3 %v2193_v23  ;;  %v2241_v20 = vor.u32 %v2933_v13, %v2240_v12  ;;  %v2369_v23 = vor.u32 %v2965_v16, %v2368_v15  ;;  %v2544_v12 = vld [vmem:[%s4484_s2 + $0x4a8] sm:$0xf]  ;;  %v3009_v13 = vld [vmem:[%s4484_s2 + $0x4b4] sm:$0xf0]  ;;  %v2178_v15 = vld [vmem:[%s4484_s2 + $0x1d8] sm:$0xf0]  ;;  %v2053_v16 = vor.u32 %v2883_v5, %v2050_v6 }
  0x6c   :  { %v2997_v52 = vld [vmem:[%s4484_s2 + $0x454] sm:$0xf0]  ;;  %v2114_v5 = vld [vmem:[%s4484_s2 + $0x158] sm:$0xf0] }
  0x6d   :  { %1427 = vmatpush.bf16.msrb.mxu1 %v2033_v40  ;;  %1453 = vmatpush.bf16.msrb.mxu0 %v2289_v43  ;;  %v2080_v40 = vld [vmem:[%s4484_s2 + $0x108] sm:$0xf] }
  0x6e   :  { %v2336_v43 = vld [vmem:[%s4484_s2 + $0x308] sm:$0xf] }
  0x6f   :  { %1465 = vmatpush.bf16.msra.mxu2 %v2433_v32  ;;  %1439 = vmatpush.bf16.msra.mxu3 %v2177_v36  ;;  %v1952_v32 = vld [vmem:[%s4484_s2 + $0x8] sm:$0xf]  ;;  %v2337_v61 = vor.u32 %v2957_v45, %v2336_v43  ;;  %v2002_v45 = vld [vmem:[%s4484_s2 + $0x78] sm:$0xf0] }
  0x70   :  { %v2576_v36 = vld [vmem:[%s4484_s2 + $0x4e8] sm:$0xf]  ;;  %v1953_v49 = vor.u32 %v2861_v35, %v1952_v32  ;;  %v2529_v32 = vor.u32 %v3005_v25, %v2528_v24  ;;  %v2859_v24 = vld [vmem:[%s4484_s2 + $0xc] sm:$0xf]  ;;  %v1954_v25 = vld [vmem:[%s4484_s2 + $0x18] sm:$0xf0] }
  0x71   :  { %1428 = vmatpush.bf16.msrb.mxu1 %v2017_v54  ;;  %1454 = vmatpush.bf16.msrb.mxu0 %v2273_v58  ;;  %v2577_v54 = vor.u32 %v3017_v37, %v2576_v36  ;;  %v3049_v58 = vld [vmem:[%s4484_s2 + $0x5f4] sm:$0xf0]  ;;  %v2656_v35 = vld [vmem:[%s4484_s2 + $0x588] sm:$0xf] }
  0x72   :  { %v3037_v36 = vld [vmem:[%s4484_s2 + $0x594] sm:$0xf0]  ;;  %v2512_v37 = vld [vmem:[%s4484_s2 + $0x468] sm:$0xf] }
  0x73   :  { %1466 = vmatpush.bf16.msra.mxu2 %v2417_v46  ;;  %1440 = vmatpush.bf16.msra.mxu3 %v2161_v50  ;;  %v2720_v46 = vld [vmem:[%s4484_s2 + $0x608] sm:$0xf]  ;;  %v2893_v50 = vld [vmem:[%s4484_s2 + $0x114] sm:$0xf0]  ;;  %v2657_v43 = vor.u32 %v3037_v36, %v2656_v35  ;;  %v2947_v35 = vld [vmem:[%s4484_s2 + $0x2cc] sm:$0xf]  ;;  %v1957_v36 = vor.u32 %v2859_v24, %v1954_v25 }
  0x74   :  { %v2721_v63 = vor.u32 %v3053_v47, %v2720_v46  ;;  %v2081_v2 = vor.u32 %v2893_v50, %v2080_v40  ;;  %v2907_v40 = vld [vmem:[%s4484_s2 + $0x18c] sm:$0xf]  ;;  %v3033_v50 = vld [vmem:[%s4484_s2 + $0x574] sm:$0xf0]  ;;  %v2386_v25 = vld [vmem:[%s4484_s2 + $0x378] sm:$0xf0] }
  0x75   :  { %1429 = vmatpush.bf16.msrb.mxu1 %v2001_v4  ;;  %1455 = vmatpush.bf16.msrb.mxu0 %v2257_v7  ;;  %v2705_v4 = vor.u32 %v3049_v58, %v2704_v56  ;;  %v2149_v47 = vor.u32 %v2907_v40, %v2146_v41  ;;  %v2082_v40 = vld [vmem:[%s4484_s2 + $0x118] sm:$0xf0] }
  0x76   :  { %2727 = vmatmul.msk.bf16.vlgmr.msrb.gmra.mxu3 %vm1239_vm0, %v3483_v48 }
  0x77   :  { %1467 = vmatpush.bf16.msra.mxu2 %v2401_v62  ;;  %1441 = vmatpush.bf16.msra.mxu3 %v2145_v1  ;;  %v3013_v62 = vld [vmem:[%s4484_s2 + $0x4d4] sm:$0xf0]  ;;  %v2194_v1 = vld [vmem:[%s4484_s2 + $0x1f8] sm:$0xf0] }
  0x78   :  { %v2561_v7 = vor.u32 %v3013_v62, %v2560_v59  ;;  %v2197_v8 = vor.u32 %v2919_v0, %v2194_v1  ;;  %v2867_v59 = vld [vmem:[%s4484_s2 + $0x4c] sm:$0xf]  ;;  %v2497_v62 = vor.u32 %v2997_v52, %v2496_v51  ;;  %v2624_v0 = vld [vmem:[%s4484_s2 + $0x548] sm:$0xf]  ;;  %v3029_v1 = vld [vmem:[%s4484_s2 + $0x554] sm:$0xf0] }
  0x79   :  { %1430 = vmatpush.bf16.msrb.mxu1 %v1985_v17  ;;  %1456 = vmatpush.bf16.msrb.mxu0 %v2241_v20  ;;  %v2545_v20 = vor.u32 %v3009_v13, %v2544_v12  ;;  %v2608_v13 = vld [vmem:[%s4484_s2 + $0x528] sm:$0xf]  ;;  %v3011_v51 = vld [vmem:[%s4484_s2 + $0x4cc] sm:$0xf]  ;;  %v2562_v52 = vld [vmem:[%s4484_s2 + $0x4d8] sm:$0xf0] }
  0x7b   :  { %1468 = vmatpush.bf16.msra.mxu2 %v2385_v11  ;;  %1442 = vmatpush.bf16.msra.mxu3 %v2129_v14  ;;  %v3045_v11 = vld [vmem:[%s4484_s2 + $0x5d4] sm:$0xf0]  ;;  %v2915_v14 = vld [vmem:[%s4484_s2 + $0x1cc] sm:$0xf] }
  0x7c   :  { %v2689_v17 = vor.u32 %v3045_v11, %v2688_v10  ;;  %v2181_v21 = vor.u32 %v2915_v14, %v2178_v15  ;;  %v1970_v10 = vld [vmem:[%s4484_s2 + $0x38] sm:$0xf0]  ;;  %v3025_v14 = vld [vmem:[%s4484_s2 + $0x534] sm:$0xf0]  ;;  %v2464_v15 = vld [vmem:[%s4484_s2 + $0x408] sm:$0xf] }
  0x7d   :  { %1431 = vmatpush.bf16.msrb.mxu1 %v1969_v29  ;;  %1457 = vmatpush.bf16.msrb.mxu0 %v2225_v33 }
  0x7f   :  { %1469 = vmatpush.bf16.msra.mxu2 %v2369_v23  ;;  %1443 = vmatpush.bf16.msra.mxu3 %v2113_v26  ;;  %v3041_v23 = vld [vmem:[%s4484_s2 + $0x5b4] sm:$0xf0]  ;;  %v2911_v26 = vld [vmem:[%s4484_s2 + $0x1ac] sm:$0xf] }
  0x80   :  { %v2673_v29 = vor.u32 %v3041_v23, %v2672_v22  ;;  %v2165_v33 = vor.u32 %v2911_v26, %v2162_v27  ;;  %v2609_v22 = vor.u32 %v3025_v14, %v2608_v13  ;;  %v2592_v23 = vld [vmem:[%s4484_s2 + $0x508] sm:$0xf]  ;;  %v3003_v14 = vld [vmem:[%s4484_s2 + $0x48c] sm:$0xf] }
  0x81   :  { %1432 = vmatpush.bf16.msrb.mxu1 %v1953_v49  ;;  %1458 = vmatpush.bf16.msrb.mxu0 %v2209_v55  ;;  %v2640_v49 = vld [vmem:[%s4484_s2 + $0x568] sm:$0xf]  ;;  %v2130_v55 = vld [vmem:[%s4484_s2 + $0x178] sm:$0xf0] }
  0x82   :  { %v2641_v58 = vor.u32 %v3033_v50, %v2640_v49  ;;  %v2434_v50 = vld [vmem:[%s4484_s2 + $0x3d8] sm:$0xf0] }
  0x83   :  { %1470 = vmatpush.bf16.msra.mxu2 %v2353_v38  ;;  %1444 = vmatpush.bf16.msra.mxu3 %v2097_v44  ;;  %v3001_v38 = vld [vmem:[%s4484_s2 + $0x474] sm:$0xf0]  ;;  %v2871_v44 = vld [vmem:[%s4484_s2 + $0x6c] sm:$0xf] }
  0x84   :  { %1459 = vmatmul.bf16.vlgmr.msrb.gmra.mxu0 %v3363_v53  ;;  %1433 = vmatmul.bf16.vlgmr.msrb.gmra.mxu1 %v3374_v57  ;;  %v2513_v46 = vor.u32 %v3001_v38, %v2512_v37  ;;  %v2005_v56 = vor.u32 %v2871_v44, %v2002_v45  ;;  %v2306_v37 = vld [vmem:[%s4484_s2 + $0x2d8] sm:$0xf0]  ;;  %v2891_v38 = vld [vmem:[%s4484_s2 + $0x10c] sm:$0xf] }
  0x85   :  { %1477 = vmatpush.bf16.msra.mxu1 %v2577_v54  ;;  %1510 = vmatpush.bf16.msra.mxu0 %v2721_v63  ;;  %v2903_v54 = vld [vmem:[%s4484_s2 + $0x16c] sm:$0xf]  ;;  %v2085_v49 = vor.u32 %v2891_v38, %v2082_v40 }
  0x86   :  { %v2133_v63 = vor.u32 %v2903_v54, %v2130_v55  ;;  %v2943_v55 = vld [vmem:[%s4484_s2 + $0x2ac] sm:$0xf] }
  0x87   :  { %1471 = vmatpush.bf16.msra.mxu2 %v2337_v61  ;;  %1445 = vmatpush.bf16.msra.mxu3 %v2081_v2  ;;  %v1986_v61 = vld [vmem:[%s4484_s2 + $0x58] sm:$0xf0]  ;;  %v2480_v2 = vld [vmem:[%s4484_s2 + $0x428] sm:$0xf]  ;;  %v2963_v38 = vld [vmem:[%s4484_s2 + $0x34c] sm:$0xf] }
  0x88   :  { %v1989_v6 = vor.u32 %v2867_v59, %v1986_v61  ;;  %v2690_v59 = vld [vmem:[%s4484_s2 + $0x5d8] sm:$0xf0] }
  0x89   :  { %1478 = vmatpush.bf16.msra.mxu1 %v2561_v7  ;;  %1529 = vmatpush.bf16.msrb.mxu0 %v2197_v8  ;;  %v2625_v7 = vor.u32 %v3029_v1, %v2624_v0  ;;  %v2863_v8 = vld [vmem:[%s4484_s2 + $0x2c] sm:$0xf]  ;;  %v2418_v1 = vld [vmem:[%s4484_s2 + $0x3b8] sm:$0xf0] }
  0x8a   :  { %1446 = vmatmul.bf16.vlgmr.msra.gmra.mxu3 %v3404_v9  ;;  %1472 = vmatmul.bf16.vlgmr.msra.gmra.mxu2 %v3376_v60  ;;  %v1973_v19 = vor.u32 %v2863_v8, %v1970_v10  ;;  %v2674_v8 = vld [vmem:[%s4484_s2 + $0x5b8] sm:$0xf0] }
  0x8b   :  { %1516 = vmatpush.bf16.msrb.mxu2 %v2069_v3  ;;  %1490 = vmatpush.bf16.msrb.mxu3 %v2705_v4  ;;  %v2993_v3 = vld [vmem:[%s4484_s2 + $0x434] sm:$0xf0]  ;;  %v2899_v4 = vld [vmem:[%s4484_s2 + $0x14c] sm:$0xf] }
  0x8c   :  { %v2481_v11 = vor.u32 %v2993_v3, %v2480_v2  ;;  %v2117_v12 = vor.u32 %v2899_v4, %v2114_v5  ;;  %v3007_v2 = vld [vmem:[%s4484_s2 + $0x4ac] sm:$0xf]  ;;  %v2546_v3 = vld [vmem:[%s4484_s2 + $0x4b8] sm:$0xf0] }
  0x8d   :  { %1479 = vmatpush.bf16.msra.mxu1 %v2545_v20  ;;  %1530 = vmatpush.bf16.msrb.mxu0 %v2181_v21  ;;  %v2951_v20 = vld [vmem:[%s4484_s2 + $0x2ec] sm:$0xf]  ;;  %v2322_v21 = vld [vmem:[%s4484_s2 + $0x2f8] sm:$0xf0] }
  0x8e   :  { %v2325_v31 = vor.u32 %v2951_v20, %v2322_v21  ;;  %v2939_v5 = vld [vmem:[%s4484_s2 + $0x28c] sm:$0xf] }
  0x8f   :  { %1517 = vmatpush.bf16.msrb.mxu2 %v2053_v16  ;;  %1491 = vmatpush.bf16.msrb.mxu3 %v2689_v17  ;;  %v2989_v16 = vld [vmem:[%s4484_s2 + $0x414] sm:$0xf0]  ;;  %v2895_v17 = vld [vmem:[%s4484_s2 + $0x12c] sm:$0xf] }
  0x90   :  { %v2465_v26 = vor.u32 %v2989_v16, %v2464_v15  ;;  %v2101_v27 = vor.u32 %v2895_v17, %v2098_v18  ;;  %v2530_v15 = vld [vmem:[%s4484_s2 + $0x498] sm:$0xf0]  ;;  %v2935_v17 = vld [vmem:[%s4484_s2 + $0x26c] sm:$0xf] }
  0x91   :  { %1480 = vmatpush.bf16.msra.mxu1 %v2529_v32  ;;  %1531 = vmatpush.bf16.msrb.mxu0 %v2165_v33  ;;  %v3015_v32 = vld [vmem:[%s4484_s2 + $0x4ec] sm:$0xf]  ;;  %v2578_v33 = vld [vmem:[%s4484_s2 + $0x4f8] sm:$0xf0] }
  0x92   :  { %v2581_v45 = vor.u32 %v3015_v32, %v2578_v33  ;;  %v2258_v18 = vld [vmem:[%s4484_s2 + $0x278] sm:$0xf0]  ;;  %v3035_v20 = vld [vmem:[%s4484_s2 + $0x58c] sm:$0xf] }
  0x93   :  { %1518 = vmatpush.bf16.msrb.mxu2 %v2037_v28  ;;  %1492 = vmatpush.bf16.msrb.mxu3 %v2673_v29  ;;  %v3021_v28 = vld [vmem:[%s4484_s2 + $0x514] sm:$0xf0]  ;;  %v2983_v29 = vld [vmem:[%s4484_s2 + $0x3ec] sm:$0xf]  ;;  %v2261_v24 = vor.u32 %v2935_v17, %v2258_v18  ;;  %v2642_v33 = vld [vmem:[%s4484_s2 + $0x578] sm:$0xf0] }
  0x94   :  { %2728 = vmatmul.msk.bf16.vlgmr.msra.gmra.mxu0 %vm1239_vm0, %v3483_v48  ;;  %v2593_v41 = vor.u32 %v3021_v28, %v2592_v23  ;;  %v2453_v44 = vor.u32 %v2983_v29, %v2450_v30  ;;  %v2967_v23 = vld [vmem:[%s4484_s2 + $0x36c] sm:$0xf] }
  0x95   :  { %1481 = vmatpush.bf16.msra.mxu1 %v2513_v46  ;;  %1532 = vmatpush.bf16.msrb.mxu0 %v2149_v47  ;;  %v2979_v46 = vld [vmem:[%s4484_s2 + $0x3cc] sm:$0xf]  ;;  %v2309_v47 = vor.u32 %v2947_v35, %v2306_v37 }
  0x96   :  { %v2437_v61 = vor.u32 %v2979_v46, %v2434_v50  ;;  %v2931_v30 = vld [vmem:[%s4484_s2 + $0x24c] sm:$0xf] }
  0x97   :  { %1519 = vmatpush.bf16.msrb.mxu2 %v2021_v42  ;;  %1493 = vmatpush.bf16.msrb.mxu3 %v2657_v43  ;;  %v3047_v42 = vld [vmem:[%s4484_s2 + $0x5ec] sm:$0xf]  ;;  %v2706_v43 = vld [vmem:[%s4484_s2 + $0x5f8] sm:$0xf0] }
  0x98   :  { %v2709_v54 = vor.u32 %v3047_v42, %v2706_v43  ;;  %v3031_v32 = vld [vmem:[%s4484_s2 + $0x56c] sm:$0xf]  ;;  %v2370_v42 = vld [vmem:[%s4484_s2 + $0x358] sm:$0xf0] }
  0x99   :  { %1482 = vmatpush.bf16.msra.mxu1 %v2497_v62  ;;  %1533 = vmatpush.bf16.msrb.mxu0 %v2133_v63  ;;  %v2565_v62 = vor.u32 %v3011_v51, %v2562_v52  ;;  %v2975_v63 = vld [vmem:[%s4484_s2 + $0x3ac] sm:$0xf]  ;;  %v2626_v51 = vld [vmem:[%s4484_s2 + $0x558] sm:$0xf0]  ;;  %v2373_v52 = vor.u32 %v2963_v38, %v2370_v42 }
  0x9a   :  { %v2421_v10 = vor.u32 %v2975_v63, %v2418_v1  ;;  %v2995_v43 = vld [vmem:[%s4484_s2 + $0x44c] sm:$0xf] }
  0x9b   :  { %1520 = vmatpush.bf16.msrb.mxu2 %v2005_v56  ;;  %1494 = vmatpush.bf16.msrb.mxu3 %v2641_v58  ;;  %v2290_v56 = vld [vmem:[%s4484_s2 + $0x2b8] sm:$0xf0]  ;;  %v3043_v58 = vld [vmem:[%s4484_s2 + $0x5cc] sm:$0xf] }
  0x9c   :  { %v2293_v0 = vor.u32 %v2943_v55, %v2290_v56  ;;  %v2693_v4 = vor.u32 %v3043_v58, %v2690_v59  ;;  %v2927_v46 = vld [vmem:[%s4484_s2 + $0x22c] sm:$0xf]  ;;  %v2354_v58 = vld [vmem:[%s4484_s2 + $0x338] sm:$0xf0] }
  0x9d   :  { %1483 = vmatpush.bf16.msra.mxu1 %v2481_v11  ;;  %1534 = vmatpush.bf16.msrb.mxu0 %v2117_v12  ;;  %v2549_v11 = vor.u32 %v3007_v2, %v2546_v3  ;;  %v2971_v12 = vld [vmem:[%s4484_s2 + $0x38c] sm:$0xf]  ;;  %v2610_v3 = vld [vmem:[%s4484_s2 + $0x538] sm:$0xf0] }
  0x9e   :  { %v3027_v50 = vld [vmem:[%s4484_s2 + $0x54c] sm:$0xf] }
  0x9f   :  { %1521 = vmatpush.bf16.msrb.mxu2 %v1989_v6  ;;  %1495 = vmatpush.bf16.msrb.mxu3 %v2625_v7  ;;  %v2274_v6 = vld [vmem:[%s4484_s2 + $0x298] sm:$0xf0]  ;;  %v3039_v7 = vld [vmem:[%s4484_s2 + $0x5ac] sm:$0xf] }
  0xa0   :  { %v2277_v13 = vor.u32 %v2939_v5, %v2274_v6  ;;  %v2677_v16 = vor.u32 %v3039_v7, %v2674_v8  ;;  %v2959_v55 = vld [vmem:[%s4484_s2 + $0x32c] sm:$0xf]  ;;  %v2722_v5 = vld [vmem:[%s4484_s2 + $0x618] sm:$0xf0] }
  0xa1   :  { %1484 = vmatpush.bf16.msra.mxu1 %v2465_v26  ;;  %1535 = vmatpush.bf16.msrb.mxu0 %v2101_v27  ;;  %v2999_v26 = vld [vmem:[%s4484_s2 + $0x46c] sm:$0xf]  ;;  %v2514_v27 = vld [vmem:[%s4484_s2 + $0x478] sm:$0xf0]  ;;  %v2357_v7 = vor.u32 %v2959_v55, %v2354_v58 }
  0xa2   :  { %v2517_v37 = vor.u32 %v2999_v26, %v2514_v27  ;;  %v2991_v59 = vld [vmem:[%s4484_s2 + $0x42c] sm:$0xf]  ;;  %v3069_v27 = vld [vmem:[%s4487_s4 + $0x78] sm:$0xff] }
  0xa3   :  { %1522 = vmatpush.bf16.msrb.mxu2 %v1973_v19  ;;  %1496 = vmatpush.bf16.msrb.mxu3 %v2609_v22  ;;  %v2533_v22 = vor.u32 %v3003_v14, %v2530_v15  ;;  %v2923_v63 = vld [vmem:[%s4484_s2 + $0x20c] sm:$0xf] }
  0xa4   :  { %1485 = vmatmul.bf16.vlgmr.msra.gmra.mxu1 %v3571_v34  ;;  %v3023_v1 = vld [vmem:[%s4484_s2 + $0x52c] sm:$0xf] }
  0xa5   :  { %1542 = vmatpush.bf16.msrb.mxu1 %v2325_v31  ;;  %1536 = vmatpush.bf16.msrb.mxu0 %v2085_v49  ;;  %v4252_v19 = vpop.f32.mrf.mxu0  ;;  %v4272_v29 = vpop.f32.mrf.mxu1  ;;  %v2242_v31 = vld [vmem:[%s4484_s2 + $0x258] sm:$0xf0]  ;;  %v2613_v14 = vor.u32 %v3023_v1, %v2610_v3  ;;  %v2987_v15 = vld [vmem:[%s4484_s2 + $0x40c] sm:$0xf] }
  0xa6   :  { %v2245_v40 = vor.u32 %v2931_v30, %v2242_v31  ;;  %v3019_v18 = vld [vmem:[%s4484_s2 + $0x50c] sm:$0xf]  ;;  %v3068_v31 = vld [vmem:[%s4487_s4 + $0x70] sm:$0xff] }
  0xa7   :  { %1523 = vmatpush.bf16.msrb.mxu2 %v1957_v36  ;;  %1497 = vmatpush.bf16.msrb.mxu3 %v2593_v41  ;;  %v2389_v36 = vor.u32 %v2967_v23, %v2386_v25  ;;  %v3061_v23 = vld [vmem:[%s4487_s4 + $0x38] sm:$0xff] }
  0xa8   :  { %1537 = vmatmul.bf16.vlgmr.msrb.gmra.mxu0 %v3404_v9  ;;  %v2658_v9 = vld [vmem:[%s4484_s2 + $0x598] sm:$0xf0]  ;;  %v4286_v35 = vpop.f32.mrf.mxu2 }
  0xa9   :  { %1543 = vmatpush.bf16.msrb.mxu1 %v2309_v47  ;;  %1581 = vmatpush.bf16.msra.mxu0 %v2709_v54  ;;  %v2661_v28 = vor.u32 %v3035_v20, %v2658_v9  ;;  %v4291_v41 = vpop.f32.mrf.mxu3  ;;  %v2226_v47 = vld [vmem:[%s4484_s2 + $0x238] sm:$0xf0] }
  0xaa   :  { %1498 = vmatmul.bf16.vlgmr.msrb.gmra.mxu3 %v3582_v39  ;;  %1524 = vmatmul.bf16.vlgmr.msrb.gmra.mxu2 %v3374_v57  ;;  %v2402_v57 = vld [vmem:[%s4484_s2 + $0x398] sm:$0xf0]  ;;  %v2229_v56 = vor.u32 %v2927_v46, %v2226_v47  ;;  %v3055_v46 = vld [vmem:[%s4487_s4 + $0x8] sm:$0xff] }
  0xab   :  { %1555 = vmatpush.bf16.msra.mxu3 %v2453_v44  ;;  %1568 = vmatpush.bf16.msra.mxu2 %v2581_v45  ;;  %v2405_v21 = vor.u32 %v2971_v12, %v2402_v57  ;;  %v2498_v44 = vld [vmem:[%s4484_s2 + $0x458] sm:$0xf0]  ;;  %v2645_v45 = vor.u32 %v3031_v32, %v2642_v33  ;;  %v2955_v12 = vld [vmem:[%s4484_s2 + $0x30c] sm:$0xf] }
  0xac   :  { %v2501_v54 = vor.u32 %v2995_v43, %v2498_v44  ;;  %v2594_v20 = vld [vmem:[%s4484_s2 + $0x518] sm:$0xf0] }
  0xad   :  { %1544 = vmatpush.bf16.msrb.mxu1 %v2293_v0  ;;  %1582 = vmatpush.bf16.msra.mxu0 %v2693_v4  ;;  %v1254_v49 = vpop.f32.mrf.mxu0  ;;  %v2210_v0 = vld [vmem:[%s4484_s2 + $0x218] sm:$0xf0]  ;;  %v1267_v2 = vpop.f32.mrf.mxu1  ;;  %v3051_v4 = vld [vmem:[%s4484_s2 + $0x60c] sm:$0xf] }
  0xae   :  { %v2725_v17 = vor.u32 %v3051_v4, %v2722_v5  ;;  %v3077_v5 = vld [vmem:[%s4487_s4 + $0xb8] sm:$0xff] }
  0xaf   :  { %1556 = vmatpush.bf16.msra.mxu3 %v2437_v61  ;;  %1569 = vmatpush.bf16.msra.mxu2 %v2565_v62  ;;  %v2482_v61 = vld [vmem:[%s4484_s2 + $0x438] sm:$0xf0]  ;;  %v2629_v62 = vor.u32 %v3027_v50, %v2626_v51  ;;  %v3054_v50 = vld [vmem:[%s4487_s4] sm:$0xff] }
  0xb0   :  { %v1280_v6 = vpop.f32.mrf.mxu2  ;;  %v2485_v8 = vor.u32 %v2991_v59, %v2482_v61 }
  0xb1   :  { %1545 = vmatpush.bf16.msrb.mxu1 %v2277_v13  ;;  %1583 = vmatpush.bf16.msra.mxu0 %v2677_v16  ;;  %v2338_v13 = vld [vmem:[%s4484_s2 + $0x318] sm:$0xf0]  ;;  %v1293_v57 = vpop.f32.mrf.mxu3  ;;  %v3076_v6 = vld [vmem:[%s4487_s4 + $0xb0] sm:$0xff] }
  0xb2   :  { %v2466_v16 = vld [vmem:[%s4484_s2 + $0x418] sm:$0xf0] }
  0xb3   :  { %1557 = vmatpush.bf16.msra.mxu3 %v2421_v10  ;;  %1570 = vmatpush.bf16.msra.mxu2 %v2549_v11  ;;  %v4347_v10 = vld [vmem:[%s4486_s3] sm:$0xf]  ;;  %v2213_v11 = vor.u32 %v2923_v63, %v2210_v0 }
  0xb4   :  { %v227_v9 = vperm.slane %v4347_v10, 0  ;;  %v228_v59 = vperm.slane %v4347_v10, 1 }
  0xb5   :  { %1546 = vmatpush.bf16.msrb.mxu1 %v2261_v24  ;;  %1584 = vmatpush.bf16.msra.mxu0 %v2661_v28  ;;  %v2597_v24 = vor.u32 %v3019_v18, %v2594_v20  ;;  %v3060_v28 = vld [vmem:[%s4487_s4 + $0x30] sm:$0xff]  ;;  %v3073_v20 = vld [vmem:[%s4487_s4 + $0x98] sm:$0xff] }
  0xb6   :  { %v1253_v25 = vadd.f32 %v4252_v19, %v227_v9  ;;  %v3072_v9 = vld [vmem:[%s4487_s4 + $0x90] sm:$0xff] }
  0xb7   :  { %1558 = vmatpush.bf16.msra.mxu3 %v2405_v21  ;;  %1571 = vmatpush.bf16.msra.mxu2 %v2533_v22  ;;  %v2341_v21 = vor.u32 %v2955_v12, %v2338_v13  ;;  %v2469_v22 = vor.u32 %v2987_v15, %v2466_v16  ;;  %v3075_v13 = vld [vmem:[%s4487_s4 + $0xa8] sm:$0xff] }
  0xb8   :  { %v1266_v19 = vadd.f32 %v4272_v29, %v1253_v25 }
  0xb9   :  { %1547 = vmatpush.bf16.msrb.mxu1 %v2245_v40  ;;  %1585 = vmatpush.bf16.msra.mxu0 %v2645_v45  ;;  %v1330_v26 = vpop.f32.mrf.mxu2  ;;  %v3066_v40 = vld [vmem:[%s4487_s4 + $0x60] sm:$0xff]  ;;  %v3065_v45 = vld [vmem:[%s4487_s4 + $0x58] sm:$0xff] }
  0xba   :  { %v1279_v32 = vadd.f32 %v4286_v35, %v1266_v19  ;;  %v3070_v19 = vld [vmem:[%s4487_s4 + $0x80] sm:$0xff] }
  0xbb   :  { %1559 = vmatpush.bf16.msra.mxu3 %v2389_v36  ;;  %1572 = vmatpush.bf16.msra.mxu2 %v2517_v37  ;;  %v3057_v36 = vld [vmem:[%s4487_s4 + $0x18] sm:$0xff] }
  0xbc   :  { %v1292_v29 = vadd.f32 %v4291_v41, %v1279_v32  ;;  %v3056_v41 = vld [vmem:[%s4487_s4 + $0x10] sm:$0xff] }
  0xbd   :  { %1548 = vmatpush.bf16.msrb.mxu1 %v2229_v56  ;;  %1586 = vmatpush.bf16.msra.mxu0 %v2629_v62  ;;  %v3062_v56 = vld [vmem:[%s4487_s4 + $0x40] sm:$0xff]  ;;  %v3084_v32 = vld [vmem:[%s4487_s4 + $0xf0] sm:$0xff] }
  0xbf   :  { %1560 = vmatpush.bf16.msra.mxu3 %v2373_v52  ;;  %1573 = vmatpush.bf16.msra.mxu2 %v2501_v54  ;;  %v3063_v54 = vld [vmem:[%s4487_s4 + $0x48] sm:$0xff] }
  0xc1   :  { %1549 = vmatpush.bf16.msrb.mxu1 %v2213_v11  ;;  %1587 = vmatpush.bf16.msra.mxu0 %v2613_v14  ;;  %v1304_v30 = vpop.f32.mrf.mxu0  ;;  %v1317_v33 = vpop.f32.mrf.mxu1  ;;  %v3074_v14 = vld [vmem:[%s4487_s4 + $0xa0] sm:$0xff] }
  0xc2   :  { %v1305_v35 = vadd.f32 %v1304_v30, %v1292_v29  ;;  %v3083_v29 = vld [vmem:[%s4487_s4 + $0xe8] sm:$0xff] }
  0xc3   :  { %1561 = vmatpush.bf16.msra.mxu3 %v2357_v7  ;;  %1574 = vmatpush.bf16.msra.mxu2 %v2485_v8 }
  0xc4   :  { %1550 = vmatmul.bf16.vlgmr.msrb.gmra.mxu1 %v3363_v53  ;;  %v3059_v53 = vld [vmem:[%s4487_s4 + $0x28] sm:$0xff]  ;;  %v1318_v44 = vadd.f32 %v1317_v33, %v1305_v35  ;;  %v229_v33 = vperm.slane %v4347_v10, 2  ;;  %v3082_v35 = vld [vmem:[%s4487_s4 + $0xe0] sm:$0xff] }
  0xc5   :  { %1601 = vmatpush.bf16.msra.mxu1 %v2725_v17  ;;  %1588 = vmatpush.bf16.msra.mxu0 %v2597_v24  ;;  %v3071_v24 = vld [vmem:[%s4487_s4 + $0x88] sm:$0xff] }
  0xc6   :  { %v1331_v47 = vadd.f32 %v1330_v26, %v1318_v44 }
  0xc7   :  { %1562 = vmatpush.bf16.msra.mxu3 %v2341_v21  ;;  %1575 = vmatpush.bf16.msra.mxu2 %v2469_v22 }
  0xc8   :  { %1589 = vmatmul.bf16.vlgmr.msra.gmra.mxu0 %v3582_v39  ;;  %v3067_v39 = vld [vmem:[%s4487_s4 + $0x68] sm:$0xff]  ;;  %v1607_v52 = vmax.f32 %v1331_v47, 0.0 }
  0xc9   :  { %1888 = vmatpush.bf16.msrb.mxu1 %v3069_v27  ;;  %v1343_v37 = vpop.f32.mrf.mxu3  ;;  %v1306_v38 = vpop.f32.mrf.mxu0 }
  0xca   :  { %1563 = vmatmul.bf16.vlgmr.msra.gmra.mxu3 %v3376_v60  ;;  %1576 = vmatmul.bf16.vlgmr.msra.gmra.mxu2 %v3571_v34  ;;  %v1332_v60 = vpop.f32.mrf.mxu2  ;;  %v3058_v34 = vld [vmem:[%s4487_s4 + $0x20] sm:$0xff]  ;;  %v1319_v42 = vpop.f32.mrf.mxu1  ;;  %v1611_v55 = vpack.c.bf16 %v1607_v52, %v1607_v52  ;;  %v1344_v62 = vadd.f32 %v1343_v37, %v228_v59  ;;  %v230_v59 = vperm.slane %v4347_v10, 3 }
  0xcb   :  { %1875 = vmatpush.bf16.msrb.mxu3 %v3061_v23  ;;  %1901 = vmatpush.bf16.msrb.mxu2 %v3077_v5 }
  0xcd   :  { %1889 = vmatpush.bf16.msrb.mxu1 %v3068_v31 }
  0xcf   :  { %1876 = vmatpush.bf16.msrb.mxu3 %v3060_v28  ;;  %1902 = vmatpush.bf16.msrb.mxu2 %v3076_v6 }
  0xd1   :  { %1890 = vmatpush.bf16.msrb.mxu1 %v3067_v39  ;;  %v1345_v49 = vpop.f32.mrf.mxu3 }
  0xd2   :  { %v1356_v43 = vpop.f32.mrf.mxu2 }
  0xd3   :  { %1877 = vmatpush.bf16.msrb.mxu3 %v3059_v53  ;;  %v1357_v2 = vadd.f32 %v1356_v43, %v1344_v62  ;;  %1903 = vmatpush.bf16.msrb.mxu2 %v3075_v13  ;;  %v3085_v53 = vld [vmem:[%s4487_s4 + $0xf8] sm:$0xff] }
  0xd4   :  { %2729 = vmatmul.msk.bf16.vlgmr.msra.gmra.mxu1 %vm1239_vm0, %v3483_v48  ;;  %v3064_v48 = vld [vmem:[%s4487_s4 + $0x50] sm:$0xff]  ;;  %1914 = vmatpush.bf16.msrb.mxu0 %v3085_v53 }
  0xd5   :  { %1891 = vmatpush.bf16.msrb.mxu1 %v3066_v40  ;;  %v3081_v40 = vld [vmem:[%s4487_s4 + $0xd8] sm:$0xff] }
  0xd7   :  { %1878 = vmatpush.bf16.msrb.mxu3 %v3058_v34  ;;  %1904 = vmatpush.bf16.msrb.mxu2 %v3074_v14 }
  0xd8   :  { %1915 = vmatpush.bf16.msrb.mxu0 %v3084_v32 }
  0xd9   :  { %1892 = vmatpush.bf16.msrb.mxu1 %v3065_v45  ;;  %v3080_v45 = vld [vmem:[%s4487_s4 + $0xd0] sm:$0xff] }
  0xda   :  { %v1358_v51 = vpop.f32.mrf.mxu2 }
  0xdb   :  { %1879 = vmatpush.bf16.msrb.mxu3 %v3057_v36  ;;  %1905 = vmatpush.bf16.msrb.mxu2 %v3073_v20 }
  0xdc   :  { %1916 = vmatpush.bf16.msrb.mxu0 %v3083_v29 }
  0xdd   :  { %1893 = vmatpush.bf16.msrb.mxu1 %v3064_v48 }
  0xdf   :  { %1880 = vmatpush.bf16.msrb.mxu3 %v3056_v41  ;;  %1906 = vmatpush.bf16.msrb.mxu2 %v3072_v9 }
  0xe0   :  { %1917 = vmatpush.bf16.msrb.mxu0 %v3082_v35 }
  0xe1   :  { %1894 = vmatpush.bf16.msrb.mxu1 %v3063_v54  ;;  %v1369_v58 = vpop.f32.mrf.mxu0  ;;  %v1382_v61 = vpop.f32.mrf.mxu1 }
  0xe2   :  { %v1370_v4 = vadd.f32 %v1369_v58, %v1357_v2 }
  0xe3   :  { %1881 = vmatpush.bf16.msrb.mxu3 %v3055_v46  ;;  %1907 = vmatpush.bf16.msrb.mxu2 %v3071_v24 }
  0xe4   :  { %v1383_v8 = vadd.f32 %v1382_v61, %v1370_v4  ;;  %1918 = vmatpush.bf16.msrb.mxu0 %v3081_v40 }
  0xe5   :  { %1895 = vmatpush.bf16.msrb.mxu1 %v3062_v56 }
  0xe7   :  { %1882 = vmatpush.bf16.msrb.mxu3 %v3054_v50  ;;  %1908 = vmatpush.bf16.msrb.mxu2 %v3070_v19  ;;  %v3079_v50 = vld [vmem:[%s4487_s4 + $0xc8] sm:$0xff] }
  0xe8   :  { %1919 = vmatpush.bf16.msrb.mxu0 %v3080_v45 }
  0xe9   :  { %v1395_v63 = vpop.f32.mrf.mxu3  ;;  %v1371_v0 = vpop.f32.mrf.mxu0 }
  0xea   :  { %1883 = vmatmul.bf16.vlgmr.msrb.gmra.mxu3 %v1611_v55  ;;  %v1384_v3 = vpop.f32.mrf.mxu1  ;;  %v1396_v12 = vadd.f32 %v1395_v63, %v1383_v8  ;;  %v3078_v55 = vld [vmem:[%s4487_s4 + $0xc0] sm:$0xff] }
  0xec   :  { %1920 = vmatpush.bf16.msrb.mxu0 %v3079_v50 }
  0xed   :  { %v1408_v1 = vpop.f32.mrf.mxu2 }
  0xee   :  { %v1409_v57 = vadd.f32 %v1408_v1, %v1396_v12 }
  0xf0   :  { %1921 = vmatpush.bf16.msrb.mxu0 %v3078_v55 }
  0xf1   :  { %v1397_v7 = vpop.f32.mrf.mxu3 }
  0xf5   :  { %v1410_v11 = vpop.f32.mrf.mxu2 }
  0xf9   :  { %v1421_v15 = vpop.f32.mrf.mxu3 }
  0xfa   :  { %v1422_v16 = vadd.f32 %v1421_v15, %v1409_v57 }
  0xfc   :  { %v1608_v17 = vmax.f32 %v1422_v16, 0.0 }
  0xfe   :  { %v1612_v18 = vpack.c.bf16 %v1608_v17, %v1608_v17 }
 0x100   :  { %1896 = vmatmul.bf16.vlgmr.msrb.gmra.mxu1 %v1612_v18  ;;  %v3086_v18 = vld [vmem:[%s4488_s5] ss:$0 sm:$0xff] }
 0x101   :  { %v1423_v21 = vpop.f32.mrf.mxu3  ;;  %v1460_v22 = vpop.f32.mrf.mxu0 }
 0x102   :  { %v1434_v23 = vpop.f32.mrf.mxu1 }
 0x103   :  { %v1435_v34 = vadd.f32 %v1434_v23, %v229_v33 }
 0x109   :  { %v1462_v26 = vpop.f32.mrf.mxu0 }
 0x10a   :  { %v1436_v28 = vpop.f32.mrf.mxu1 }
 0x10d   :  { %v1447_v25 = vpop.f32.mrf.mxu3  ;;  %v1473_v27 = vpop.f32.mrf.mxu2 }
 0x10e   :  { %v1448_v36 = vadd.f32 %v1447_v25, %v1435_v34 }
 0x110   :  { %v1461_v38 = vadd.f32 %v1460_v22, %v1448_v36 }
 0x111   :  { %v1512_v31 = vpop.f32.mrf.mxu0 }
 0x112   :  { %v1474_v42 = vadd.f32 %v1473_v27, %v1461_v38 }
 0x115   :  { %v1449_v30 = vpop.f32.mrf.mxu3  ;;  %v1475_v60 = vpop.f32.mrf.mxu2 }
 0x119   :  { %v1514_v39 = vpop.f32.mrf.mxu0 }
 0x121   :  { %v1486_v37 = vpop.f32.mrf.mxu1 }
 0x122   :  { %v1487_v43 = vadd.f32 %v1486_v37, %v1474_v42 }
 0x125   :  { %v1538_v41 = vpop.f32.mrf.mxu0 }
 0x129   :  { %v1488_v44 = vpop.f32.mrf.mxu1 }
 0x12d   :  { %v1499_v46 = vpop.f32.mrf.mxu3  ;;  %v1525_v47 = vpop.f32.mrf.mxu2 }
 0x12e   :  { %v1500_v48 = vadd.f32 %v1499_v46, %v1487_v43  ;;  %v1540_v52 = vpop.f32.mrf.mxu0  ;;  %v1526_v61 = vadd.f32 %v1525_v47, %v230_v59 }
 0x130   :  { %v1513_v49 = vadd.f32 %v1512_v31, %v1500_v48  ;;  %v1539_v63 = vadd.f32 %v1538_v41, %v1526_v61 }
 0x132   :  { %v1609_v51 = vmax.f32 %v1513_v49, 0.0 }
 0x134   :  { %v1613_v54 = vpack.c.bf16 %v1609_v51, %v1609_v51 }
 0x135   :  { %v1501_v56 = vpop.f32.mrf.mxu3  ;;  %v1527_v58 = vpop.f32.mrf.mxu2 }
 0x136   :  { %1909 = vmatmul.bf16.vlgmr.msrb.gmra.mxu2 %v1613_v54 }
 0x141   :  { %v1551_v62 = vpop.f32.mrf.mxu1 }
 0x142   :  { %v1552_v1 = vadd.f32 %v1551_v62, %v1539_v63 }
 0x145   :  { %v1590_v0 = vpop.f32.mrf.mxu0 }
 0x149   :  { %v1553_v2 = vpop.f32.mrf.mxu1 }
 0x14d   :  { %v1564_v3 = vpop.f32.mrf.mxu3  ;;  %v1577_v5 = vpop.f32.mrf.mxu2 }
 0x14e   :  { %v1565_v4 = vadd.f32 %v1564_v3, %v1552_v1  ;;  %v1592_v7 = vpop.f32.mrf.mxu0 }
 0x150   :  { %v1578_v6 = vadd.f32 %v1577_v5, %v1565_v4 }
 0x151   :  { %v1603_v11 = vpop.f32.mrf.mxu1 }
 0x152   :  { %v1591_v8 = vadd.f32 %v1590_v0, %v1578_v6 }
 0x154   :  { %v1604_v12 = vadd.f32 %v1603_v11, %v1591_v8 }
 0x155   :  { %v1566_v13 = vpop.f32.mrf.mxu3  ;;  %v1579_v57 = vpop.f32.mrf.mxu2 }
 0x156   :  { %v1610_v14 = vmax.f32 %v1604_v12, 0.0 }
 0x158   :  { %v1614_v15 = vpack.c.bf16 %v1610_v14, %v1610_v14 }
 0x159   :  { %v1605_v10 = vpop.f32.mrf.mxu1 }
 0x15a   :  { %1922 = vmatmul.bf16.vlgmr.msrb.gmra.mxu0 %v1614_v15 }
 0x16d   :  { %v1884_v16 = vpop.f32.mrf.mxu3 }
 0x16e   :  { %v1885_v20 = vadd.f32 %v3086_v18, %v1884_v16 }
 0x175   :  { %v1886_v17 = vpop.f32.mrf.mxu3 }
 0x17d   :  { %v1897_v9 = vpop.f32.mrf.mxu1 }
 0x17e   :  { %v1898_v21 = vadd.f32 %v1897_v9, %v1885_v20 }
 0x185   :  { %v1899_v22 = vpop.f32.mrf.mxu1 }
 0x1b9   :  { %v1910_v23 = vpop.f32.mrf.mxu2 }
 0x1ba   :  { %v1911_v25 = vadd.f32 %v1910_v23, %v1898_v21 }
 0x1c1   :  { %v1912_v24 = vpop.f32.mrf.mxu2 }
 0x1d7   :  { %v1923_v26 = vpop.f32.mrf.mxu0 }
 0x1d8   :  { %v1924_v27 = vadd.f32 %v1923_v26, %v1911_v25 }
 0x1da   :  { %1927 = vmax.xlane.f32.xlu0 %v1924_v27 }
 0x1df   :  { %v1925_v28 = vpop.f32.mrf.mxu0 }
 0x24d   :  { %v1928_v19 = vpop.xlane.xlu0 %1927 }
 0x24e   :  { %v1929_v53 = vsub.f32 %v1924_v27, %v1928_v19 }
 0x250   :  { %v1930_v30 = vmul.f32 1.442695, %v1929_v53 }
 0x252   :  { %3087 = vpow2.f32 %v1930_v30 }
 0x258   :  { %v3088_v31 = vpop.eup %3087 }
 0x259   :  { %1932 = vadd.xlane.f32.xlu0 %v3088_v31 }
 0x2cc   :  { %v1933_v32 = vpop.xlane.xlu0 %1932 }
 0x2cd   :  { %3089 = vlog2.f32 %v1933_v32 }
 0x2d3   :  { %v3090_v33 = vpop.eup %3089 }
 0x2d4   :  { %v1935_v60 = vmul.f32 0.6931472, %v3090_v33 }
 0x2d6   :  { %v1936_v34 = vsub.f32 %v1929_v53, %v1935_v60 }
 0x2d8   :  { %1937 = vst [vmem:[%s4489_s6] sm:$0xff] %v1936_v34 }

</bundles_post_ra>
